<compile_context>
chip_gen: v7x
topology: tpu7x:2x2x1
jax: 0.10.0
libtpu: 0.0.40
codegen_flags: <defaults>
</compile_context>

<pallas_src>
import functools

import jax
import jax.numpy as jnp
import numpy as np
from jax import lax
from jax.experimental import pallas as pl
from jax.experimental.pallas import tpu as pltpu


# ----------------------------- Pallas kernel -------------------------------
def _make_kernel(Cout, Wout, P):
    def kernel(y_ref, kb_ref, m_ref, w1_ref, b1_ref, w2_ref, b2_ref, o_ref):
        f32 = jnp.float32

        # Bilinear upsample (align_corners=True) + lane-flatten in ONE matmul:
        # rows = (zero-padded) channels, lanes = (n, o, v).
        x0 = jnp.dot(y_ref[...], kb_ref[...],
                     preferred_element_type=f32)            # (Cinp, P)

        # Border masks, loaded once and reused by both convs.  Row k zeroes the
        # lanes where tap (ky, kx) would read across an image or row boundary
        # (this also kills pltpu.roll wraparound / cross-image leakage).
        mall = m_ref[...]                                    # (9, P)

        def conv3x3(x, w_ref, b_ref):
            """3x3 conv (pad=1) as 9 accumulated matmuls on roll-shifted taps."""
            acc = None
            for ky in range(3):
                for kx in range(3):
                    k = ky * 3 + kx
                    dy, dx = ky - 1, kx - 1
                    off = dy * Wout + dx
                    if off == 0:
                        sh = x
                    else:
                        # sh[c, p] = x[c, p + off]; invalid lanes zeroed by mask.
                        sh = pltpu.roll(x, shift=(-off) % P, axis=1)
                        sh = sh * mall[k:k + 1, :]
                    w_tap = w_ref[k * Cout:(k + 1) * Cout, :]   # aligned 8-row slice
                    t = jnp.dot(w_tap, sh, preferred_element_type=f32)
                    acc = t if acc is None else acc + t
            return acc + b_ref[...]                          # (Cout, P)

        a1 = jnp.maximum(conv3x3(x0, w1_ref, b1_ref), 0.0)   # conv1 + ReLU
        a2 = conv3x3(a1, w2_ref, b2_ref)                     # conv2

        # lane-dense store: last dim P = N*Hout*Wout (multiple of 128).
        o_ref[...] = a2.astype(o_ref.dtype)

    return kernel


# ----------------------------- wrapper (glue) -------------------------------
def interp_matrix(out_size: int, in_size: int) -> np.ndarray:
    """Row-interpolation matrix for bilinear upsample with align_corners=True."""
    A = np.zeros((out_size, in_size), np.float32)
    if out_size == 1 or in_size == 1:
        A[:, 0] = 1.0
        return A
    scale = (in_size - 1) / (out_size - 1)
    for i in range(out_size):
        src = i * scale
        j0 = min(int(np.floor(src)), in_size - 1)
        j1 = min(j0 + 1, in_size - 1)
        f = src - j0
        A[i, j0] += 1.0 - f
        A[i, j1] += f
    return A


@functools.partial(jax.jit, static_argnames=("s_size",))
def up_9x9_forward(y, x, w1, b1, w2, b2, *, s_size):
    """y, x: NCHW; weights in PyTorch OIHW layout. Returns NCHW output."""
    y1 = jnp.concatenate([y, x], axis=1)                    # (N, Cin, H, W)
    N, Cin, H, W = y1.shape
    Hout, Wout = H * s_size, W * s_size
    Cout = w1.shape[0]
    P = N * Hout * Wout
    NHW = N * H * W
    Cinp = -(-Cin // 8) * 8                                  # pad channels to 8

    # channels-first, lane-flattened input: Y[c, n*H*W + h*W + w] = y1[n, c, h, w]
    Yk = jnp.transpose(y1, (1, 0, 2, 3)).reshape(Cin, NHW).astype(jnp.float32)
    if Cinp > Cin:
        Yk = jnp.concatenate(
            [Yk, jnp.zeros((Cinp - Cin, NHW), jnp.float32)], axis=0)

    # Bilinear (align_corners=True) upsample as ONE Kronecker matmul.  Kb is
    # block-diagonal over images so the result is already lane-flattened (n,o,v).
    A_h = interp_matrix(Hout, H)                             # (Hout, H)
    A_w = interp_matrix(Wout, W)                             # (Wout, W)
    Kmat = np.kron(A_h, A_w).T                               # (H*W, Hout*Wout)
    Kb_np = np.zeros((NHW, P), np.float32)
    for n in range(N):
        Kb_np[n * H * W:(n + 1) * H * W,
              n * Hout * Wout:(n + 1) * Hout * Wout] = Kmat
    Kb = jnp.asarray(Kb_np)                                  # (NHW, P), 256 KiB here

    # Precomputed border masks, one row per 3x3 tap (center row is all-ones).
    pos = np.arange(P)
    o_idx = (pos // Wout) % Hout
    v_idx = pos % Wout
    masks_np = np.zeros((9, P), np.float32)
    for ky in range(3):
        for kx in range(3):
            dy, dx = ky - 1, kx - 1
            valid = ((o_idx + dy >= 0) & (o_idx + dy < Hout) &
                     (v_idx + dx >= 0) & (v_idx + dx < Wout))
            masks_np[ky * 3 + kx] = valid.astype(np.float32)
    masks = jnp.asarray(masks_np)                            # (9, P)

    # Conv weights stacked per tap as (9*Cout, C) row blocks (k = ky*3 + kx),
    # with conv1's input-channel dim zero-padded to Cinp for alignment.
    w1t = jnp.transpose(w1.astype(jnp.float32), (2, 3, 0, 1)).reshape(9, Cout, Cin)
    w1t = jnp.pad(w1t, ((0, 0), (0, 0), (0, Cinp - Cin))).reshape(9 * Cout, Cinp)
    w2t = jnp.transpose(w2.astype(jnp.float32), (2, 3, 0, 1)).reshape(9 * Cout, Cout)
    b1c = b1.reshape(Cout, 1).astype(jnp.float32)
    b2c = b2.reshape(Cout, 1).astype(jnp.float32)

    kernel = _make_kernel(Cout, Wout, P)

    out2d = pl.pallas_call(
        kernel,
        out_shape=jax.ShapeDtypeStruct((Cout, P), jnp.float32),
        grid=(1,),                                           # batch folded into P
        in_specs=[
            pl.BlockSpec((Cinp, NHW), lambda i: (0, 0)),
            pl.BlockSpec((NHW, P), lambda i: (0, 0)),
            pl.BlockSpec((9, P), lambda i: (0, 0)),
            pl.BlockSpec((9 * Cout, Cinp), lambda i: (0, 0)),
            pl.BlockSpec((Cout, 1), lambda i: (0, 0)),
            pl.BlockSpec((9 * Cout, Cout), lambda i: (0, 0)),
            pl.BlockSpec((Cout, 1), lambda i: (0, 0)),
        ],
        out_specs=pl.BlockSpec((Cout, P), lambda i: (0, 0)),
        compiler_params=pltpu.CompilerParams(
            dimension_semantics=("arbitrary",)),
    )(Yk, Kb, masks, w1t, b1c, w2t, b2c)

    # (Cout, N, Hout, Wout) -> NCHW (cheap wrapper-side glue).
    return jnp.transpose(out2d.reshape(Cout, N, Hout, Wout), (1, 0, 2, 3))


# ----------------------------- pure-JAX reference ---------------------------
def ref_forward(y, x, w1, b1, w2, b2, *, s_size):
    y1 = jnp.concatenate([y, x], axis=1)
    N, Cin, H, W = y1.shape
    A_h = jnp.asarray(interp_matrix(H * s_size, H))
    A_w = jnp.asarray(interp_matrix(W * s_size, W))
    up = jnp.einsum('oh,nchw,vw->ncov', A_h, y1, A_w)
    dn = ('NCHW', 'OIHW', 'NCHW')
    z = lax.conv_general_dilated(up, w1, (1, 1), ((1, 1), (1, 1)),
                                 dimension_numbers=dn)
    z = jnp.maximum(z + b1[None, :, None, None], 0.0)
    out = lax.conv_general_dilated(z, w2, (1, 1), ((1, 1), (1, 1)),
                                   dimension_numbers=dn)
    return out + b2[None, :, None, None]


# ----------------------------- main -----------------------------------------
if __name__ == "__main__":
    # module config: in_channels=4, out_channels=8, s_size=2, bilinear=True
    N, Cy, Cx, H, W = 2, 2, 2, 8, 8
    C_in, C_out, s_size = Cy + Cx, 8, 2

    key = jax.random.PRNGKey(0)
    k1, k2, k3, k4, k5, k6 = jax.random.split(key, 6)
    y = jax.random.normal(k1, (N, Cy, H, W), jnp.float32)
    x = jax.random.normal(k2, (N, Cx, H, W), jnp.float32)
    # deterministic "conv" parameters (PyTorch OIHW layout)
    w1 = 0.1 * jax.random.normal(k3, (C_out, C_in, 3, 3), jnp.float32)
    b1 = 0.1 * jax.random.normal(k4, (C_out,), jnp.float32)
    w2 = 0.1 * jax.random.normal(k5, (C_out, C_out, 3, 3), jnp.float32)
    b2 = 0.1 * jax.random.normal(k6, (C_out,), jnp.float32)

    out = up_9x9_forward(y, x, w1, b1, w2, b2, s_size=s_size)
    out = jax.block_until_ready(out)

    ref = ref_forward(y, x, w1, b1, w2, b2, s_size=s_size)
    assert out.shape == (N, C_out, H * s_size, W * s_size), out.shape
    err = float(jnp.max(jnp.abs(out - ref)))
    assert err < 5e-4, err

    print("KERNEL_OK")
</pallas_src>

<mosaic_0001>
module attributes {stable_mosaic.version = 11 : i64} {
  func.func @kernel(%arg0: i32, %arg1: memref<8x128xf32, #tpu.memory_space<vmem>>, %arg2: memref<128x512xf32, #tpu.memory_space<vmem>>, %arg3: memref<9x512xf32, #tpu.memory_space<vmem>>, %arg4: memref<72x8xf32, #tpu.memory_space<vmem>>, %arg5: memref<8x1xf32, #tpu.memory_space<vmem>>, %arg6: memref<72x8xf32, #tpu.memory_space<vmem>>, %arg7: memref<8x1xf32, #tpu.memory_space<vmem>>, %arg8: memref<8x512xf32, #tpu.memory_space<vmem>>) attributes {dimension_semantics = [#tpu.dimension_semantics<arbitrary>], iteration_bounds = array<i64: 1>, scalar_prefetch = 0 : i64, scratch_operands = 0 : i64, tpu.core_type = #tpu.core_type<tc>, window_params = [{pipeline_mode = #tpu.pipeline_mode<synchronous>, transform_indices = @transform_0, window_bounds = array<i64: 8, 128>}, {pipeline_mode = #tpu.pipeline_mode<synchronous>, transform_indices = @transform_1, window_bounds = array<i64: 128, 512>}, {pipeline_mode = #tpu.pipeline_mode<synchronous>, transform_indices = @transform_2, window_bounds = array<i64: 9, 512>}, {pipeline_mode = #tpu.pipeline_mode<synchronous>, transform_indices = @transform_3, window_bounds = array<i64: 72, 8>}, {pipeline_mode = #tpu.pipeline_mode<synchronous>, transform_indices = @transform_4, window_bounds = array<i64: 8, 1>}, {pipeline_mode = #tpu.pipeline_mode<synchronous>, transform_indices = @transform_5, window_bounds = array<i64: 72, 8>}, {pipeline_mode = #tpu.pipeline_mode<synchronous>, transform_indices = @transform_6, window_bounds = array<i64: 8, 1>}, {pipeline_mode = #tpu.pipeline_mode<synchronous>, transform_indices = @transform_7, window_bounds = array<i64: 8, 512>}]} {
    %c0 = arith.constant 0 : index
    %c0_0 = arith.constant 0 : index
    %0 = vector.load %arg1[%c0, %c0_0] : memref<8x128xf32, #tpu.memory_space<vmem>>, vector<8x128xf32>
    %c0_1 = arith.constant 0 : index
    %c0_2 = arith.constant 0 : index
    %1 = vector.load %arg2[%c0_1, %c0_2] : memref<128x512xf32, #tpu.memory_space<vmem>>, vector<128x512xf32>
    %cst = arith.constant dense<0.000000e+00> : vector<8x512xf32>
    %2 = tpu.matmul %0, %1, %cst {dimension_numbers = #tpu.dot_dimension_numbers<[1], [0], [0], [1], [0, 0, 1, 1], [], []>} : vector<8x128xf32>, vector<128x512xf32>, vector<8x512xf32> -> vector<8x512xf32>
    %c0_3 = arith.constant 0 : index
    %c0_4 = arith.constant 0 : index
    %3 = vector.load %arg3[%c0_3, %c0_4] : memref<9x512xf32, #tpu.memory_space<vmem>>, vector<9x512xf32>
    %c17_i32 = arith.constant 17 : i32
    %4 = tpu.dynamic_rotate %2 by %c17_i32 dim 1 : vector<8x512xf32>, i32 -> vector<8x512xf32>
    %5 = vector.extract_strided_slice %3 {offsets = [0, 0], sizes = [1, 512], strides = [1, 1]} : vector<9x512xf32> to vector<1x512xf32>
    %6 = vector.broadcast %5 : vector<1x512xf32> to vector<8x512xf32>
    %7 = arith.mulf %4, %6 : vector<8x512xf32>
    %c0_5 = arith.constant 0 : index
    %c0_6 = arith.constant 0 : index
    %8 = vector.load %arg4[%c0_5, %c0_6] : memref<72x8xf32, #tpu.memory_space<vmem>>, vector<8x8xf32>
    %cst_7 = arith.constant dense<0.000000e+00> : vector<8x512xf32>
    %9 = tpu.matmul %8, %7, %cst_7 {dimension_numbers = #tpu.dot_dimension_numbers<[1], [0], [0], [1], [0, 0, 1, 1], [], []>} : vector<8x8xf32>, vector<8x512xf32>, vector<8x512xf32> -> vector<8x512xf32>
    %c16_i32 = arith.constant 16 : i32
    %10 = tpu.dynamic_rotate %2 by %c16_i32 dim 1 : vector<8x512xf32>, i32 -> vector<8x512xf32>
    %11 = vector.extract_strided_slice %3 {offsets = [1, 0], sizes = [1, 512], strides = [1, 1]} : vector<9x512xf32> to vector<1x512xf32>
    %12 = vector.broadcast %11 : vector<1x512xf32> to vector<8x512xf32>
    %13 = arith.mulf %10, %12 : vector<8x512xf32>
    %c8 = arith.constant 8 : index
    %c0_8 = arith.constant 0 : index
    %14 = vector.load %arg4[%c8, %c0_8] : memref<72x8xf32, #tpu.memory_space<vmem>>, vector<8x8xf32>
    %cst_9 = arith.constant dense<0.000000e+00> : vector<8x512xf32>
    %15 = tpu.matmul %14, %13, %cst_9 {dimension_numbers = #tpu.dot_dimension_numbers<[1], [0], [0], [1], [0, 0, 1, 1], [], []>} : vector<8x8xf32>, vector<8x512xf32>, vector<8x512xf32> -> vector<8x512xf32>
    %16 = arith.addf %9, %15 : vector<8x512xf32>
    %c15_i32 = arith.constant 15 : i32
    %17 = tpu.dynamic_rotate %2 by %c15_i32 dim 1 : vector<8x512xf32>, i32 -> vector<8x512xf32>
    %18 = vector.extract_strided_slice %3 {offsets = [2, 0], sizes = [1, 512], strides = [1, 1]} : vector<9x512xf32> to vector<1x512xf32>
    %19 = vector.broadcast %18 : vector<1x512xf32> to vector<8x512xf32>
    %20 = arith.mulf %17, %19 : vector<8x512xf32>
    %c16 = arith.constant 16 : index
    %c0_10 = arith.constant 0 : index
    %21 = vector.load %arg4[%c16, %c0_10] : memref<72x8xf32, #tpu.memory_space<vmem>>, vector<8x8xf32>
    %cst_11 = arith.constant dense<0.000000e+00> : vector<8x512xf32>
    %22 = tpu.matmul %21, %20, %cst_11 {dimension_numbers = #tpu.dot_dimension_numbers<[1], [0], [0], [1], [0, 0, 1, 1], [], []>} : vector<8x8xf32>, vector<8x512xf32>, vector<8x512xf32> -> vector<8x512xf32>
    %23 = arith.addf %16, %22 : vector<8x512xf32>
    %c1_i32 = arith.constant 1 : i32
    %24 = tpu.dynamic_rotate %2 by %c1_i32 dim 1 : vector<8x512xf32>, i32 -> vector<8x512xf32>
    %25 = vector.extract_strided_slice %3 {offsets = [3, 0], sizes = [1, 512], strides = [1, 1]} : vector<9x512xf32> to vector<1x512xf32>
    %26 = vector.broadcast %25 : vector<1x512xf32> to vector<8x512xf32>
    %27 = arith.mulf %24, %26 : vector<8x512xf32>
    %c24 = arith.constant 24 : index
    %c0_12 = arith.constant 0 : index
    %28 = vector.load %arg4[%c24, %c0_12] : memref<72x8xf32, #tpu.memory_space<vmem>>, vector<8x8xf32>
    %cst_13 = arith.constant dense<0.000000e+00> : vector<8x512xf32>
    %29 = tpu.matmul %28, %27, %cst_13 {dimension_numbers = #tpu.dot_dimension_numbers<[1], [0], [0], [1], [0, 0, 1, 1], [], []>} : vector<8x8xf32>, vector<8x512xf32>, vector<8x512xf32> -> vector<8x512xf32>
    %30 = arith.addf %23, %29 : vector<8x512xf32>
    %c32 = arith.constant 32 : index
    %c0_14 = arith.constant 0 : index
    %31 = vector.load %arg4[%c32, %c0_14] : memref<72x8xf32, #tpu.memory_space<vmem>>, vector<8x8xf32>
    %cst_15 = arith.constant dense<0.000000e+00> : vector<8x512xf32>
    %32 = tpu.matmul %31, %2, %cst_15 {dimension_numbers = #tpu.dot_dimension_numbers<[1], [0], [0], [1], [0, 0, 1, 1], [], []>} : vector<8x8xf32>, vector<8x512xf32>, vector<8x512xf32> -> vector<8x512xf32>
    %33 = arith.addf %30, %32 : vector<8x512xf32>
    %c511_i32 = arith.constant 511 : i32
    %34 = tpu.dynamic_rotate %2 by %c511_i32 dim 1 : vector<8x512xf32>, i32 -> vector<8x512xf32>
    %35 = vector.extract_strided_slice %3 {offsets = [5, 0], sizes = [1, 512], strides = [1, 1]} : vector<9x512xf32> to vector<1x512xf32>
    %36 = vector.broadcast %35 : vector<1x512xf32> to vector<8x512xf32>
    %37 = arith.mulf %34, %36 : vector<8x512xf32>
    %c40 = arith.constant 40 : index
    %c0_16 = arith.constant 0 : index
    %38 = vector.load %arg4[%c40, %c0_16] : memref<72x8xf32, #tpu.memory_space<vmem>>, vector<8x8xf32>
    %cst_17 = arith.constant dense<0.000000e+00> : vector<8x512xf32>
    %39 = tpu.matmul %38, %37, %cst_17 {dimension_numbers = #tpu.dot_dimension_numbers<[1], [0], [0], [1], [0, 0, 1, 1], [], []>} : vector<8x8xf32>, vector<8x512xf32>, vector<8x512xf32> -> vector<8x512xf32>
    %40 = arith.addf %33, %39 : vector<8x512xf32>
    %c497_i32 = arith.constant 497 : i32
    %41 = tpu.dynamic_rotate %2 by %c497_i32 dim 1 : vector<8x512xf32>, i32 -> vector<8x512xf32>
    %42 = vector.extract_strided_slice %3 {offsets = [6, 0], sizes = [1, 512], strides = [1, 1]} : vector<9x512xf32> to vector<1x512xf32>
    %43 = vector.broadcast %42 : vector<1x512xf32> to vector<8x512xf32>
    %44 = arith.mulf %41, %43 : vector<8x512xf32>
    %c48 = arith.constant 48 : index
    %c0_18 = arith.constant 0 : index
    %45 = vector.load %arg4[%c48, %c0_18] : memref<72x8xf32, #tpu.memory_space<vmem>>, vector<8x8xf32>
    %cst_19 = arith.constant dense<0.000000e+00> : vector<8x512xf32>
    %46 = tpu.matmul %45, %44, %cst_19 {dimension_numbers = #tpu.dot_dimension_numbers<[1], [0], [0], [1], [0, 0, 1, 1], [], []>} : vector<8x8xf32>, vector<8x512xf32>, vector<8x512xf32> -> vector<8x512xf32>
    %47 = arith.addf %40, %46 : vector<8x512xf32>
    %c496_i32 = arith.constant 496 : i32
    %48 = tpu.dynamic_rotate %2 by %c496_i32 dim 1 : vector<8x512xf32>, i32 -> vector<8x512xf32>
    %49 = vector.extract_strided_slice %3 {offsets = [7, 0], sizes = [1, 512], strides = [1, 1]} : vector<9x512xf32> to vector<1x512xf32>
    %50 = vector.broadcast %49 : vector<1x512xf32> to vector<8x512xf32>
    %51 = arith.mulf %48, %50 : vector<8x512xf32>
    %c56 = arith.constant 56 : index
    %c0_20 = arith.constant 0 : index
    %52 = vector.load %arg4[%c56, %c0_20] : memref<72x8xf32, #tpu.memory_space<vmem>>, vector<8x8xf32>
    %cst_21 = arith.constant dense<0.000000e+00> : vector<8x512xf32>
    %53 = tpu.matmul %52, %51, %cst_21 {dimension_numbers = #tpu.dot_dimension_numbers<[1], [0], [0], [1], [0, 0, 1, 1], [], []>} : vector<8x8xf32>, vector<8x512xf32>, vector<8x512xf32> -> vector<8x512xf32>
    %54 = arith.addf %47, %53 : vector<8x512xf32>
    %c495_i32 = arith.constant 495 : i32
    %55 = tpu.dynamic_rotate %2 by %c495_i32 dim 1 : vector<8x512xf32>, i32 -> vector<8x512xf32>
    %56 = vector.extract_strided_slice %3 {offsets = [8, 0], sizes = [1, 512], strides = [1, 1]} : vector<9x512xf32> to vector<1x512xf32>
    %57 = vector.broadcast %56 : vector<1x512xf32> to vector<8x512xf32>
    %58 = arith.mulf %55, %57 : vector<8x512xf32>
    %c64 = arith.constant 64 : index
    %c0_22 = arith.constant 0 : index
    %59 = vector.load %arg4[%c64, %c0_22] : memref<72x8xf32, #tpu.memory_space<vmem>>, vector<8x8xf32>
    %cst_23 = arith.constant dense<0.000000e+00> : vector<8x512xf32>
    %60 = tpu.matmul %59, %58, %cst_23 {dimension_numbers = #tpu.dot_dimension_numbers<[1], [0], [0], [1], [0, 0, 1, 1], [], []>} : vector<8x8xf32>, vector<8x512xf32>, vector<8x512xf32> -> vector<8x512xf32>
    %61 = arith.addf %54, %60 : vector<8x512xf32>
    %c0_24 = arith.constant 0 : index
    %c0_25 = arith.constant 0 : index
    %62 = vector.load %arg5[%c0_24, %c0_25] : memref<8x1xf32, #tpu.memory_space<vmem>>, vector<8x1xf32>
    %63 = vector.broadcast %62 : vector<8x1xf32> to vector<8x512xf32>
    %64 = arith.addf %61, %63 : vector<8x512xf32>
    %cst_26 = arith.constant 0.000000e+00 : f32
    %65 = vector.broadcast %cst_26 : f32 to vector<8x512xf32>
    %66 = arith.maximumf %64, %65 : vector<8x512xf32>
    %c17_i32_27 = arith.constant 17 : i32
    %67 = tpu.dynamic_rotate %66 by %c17_i32_27 dim 1 : vector<8x512xf32>, i32 -> vector<8x512xf32>
    %68 = vector.extract_strided_slice %3 {offsets = [0, 0], sizes = [1, 512], strides = [1, 1]} : vector<9x512xf32> to vector<1x512xf32>
    %69 = vector.broadcast %68 : vector<1x512xf32> to vector<8x512xf32>
    %70 = arith.mulf %67, %69 : vector<8x512xf32>
    %c0_28 = arith.constant 0 : index
    %c0_29 = arith.constant 0 : index
    %71 = vector.load %arg6[%c0_28, %c0_29] : memref<72x8xf32, #tpu.memory_space<vmem>>, vector<8x8xf32>
    %cst_30 = arith.constant dense<0.000000e+00> : vector<8x512xf32>
    %72 = tpu.matmul %71, %70, %cst_30 {dimension_numbers = #tpu.dot_dimension_numbers<[1], [0], [0], [1], [0, 0, 1, 1], [], []>} : vector<8x8xf32>, vector<8x512xf32>, vector<8x512xf32> -> vector<8x512xf32>
    %c16_i32_31 = arith.constant 16 : i32
    %73 = tpu.dynamic_rotate %66 by %c16_i32_31 dim 1 : vector<8x512xf32>, i32 -> vector<8x512xf32>
    %74 = vector.extract_strided_slice %3 {offsets = [1, 0], sizes = [1, 512], strides = [1, 1]} : vector<9x512xf32> to vector<1x512xf32>
    %75 = vector.broadcast %74 : vector<1x512xf32> to vector<8x512xf32>
    %76 = arith.mulf %73, %75 : vector<8x512xf32>
    %c8_32 = arith.constant 8 : index
    %c0_33 = arith.constant 0 : index
    %77 = vector.load %arg6[%c8_32, %c0_33] : memref<72x8xf32, #tpu.memory_space<vmem>>, vector<8x8xf32>
    %cst_34 = arith.constant dense<0.000000e+00> : vector<8x512xf32>
    %78 = tpu.matmul %77, %76, %cst_34 {dimension_numbers = #tpu.dot_dimension_numbers<[1], [0], [0], [1], [0, 0, 1, 1], [], []>} : vector<8x8xf32>, vector<8x512xf32>, vector<8x512xf32> -> vector<8x512xf32>
    %79 = arith.addf %72, %78 : vector<8x512xf32>
    %c15_i32_35 = arith.constant 15 : i32
    %80 = tpu.dynamic_rotate %66 by %c15_i32_35 dim 1 : vector<8x512xf32>, i32 -> vector<8x512xf32>
    %81 = vector.extract_strided_slice %3 {offsets = [2, 0], sizes = [1, 512], strides = [1, 1]} : vector<9x512xf32> to vector<1x512xf32>
    %82 = vector.broadcast %81 : vector<1x512xf32> to vector<8x512xf32>
    %83 = arith.mulf %80, %82 : vector<8x512xf32>
    %c16_36 = arith.constant 16 : index
    %c0_37 = arith.constant 0 : index
    %84 = vector.load %arg6[%c16_36, %c0_37] : memref<72x8xf32, #tpu.memory_space<vmem>>, vector<8x8xf32>
    %cst_38 = arith.constant dense<0.000000e+00> : vector<8x512xf32>
    %85 = tpu.matmul %84, %83, %cst_38 {dimension_numbers = #tpu.dot_dimension_numbers<[1], [0], [0], [1], [0, 0, 1, 1], [], []>} : vector<8x8xf32>, vector<8x512xf32>, vector<8x512xf32> -> vector<8x512xf32>
    %86 = arith.addf %79, %85 : vector<8x512xf32>
    %c1_i32_39 = arith.constant 1 : i32
    %87 = tpu.dynamic_rotate %66 by %c1_i32_39 dim 1 : vector<8x512xf32>, i32 -> vector<8x512xf32>
    %88 = vector.extract_strided_slice %3 {offsets = [3, 0], sizes = [1, 512], strides = [1, 1]} : vector<9x512xf32> to vector<1x512xf32>
    %89 = vector.broadcast %88 : vector<1x512xf32> to vector<8x512xf32>
    %90 = arith.mulf %87, %89 : vector<8x512xf32>
    %c24_40 = arith.constant 24 : index
    %c0_41 = arith.constant 0 : index
    %91 = vector.load %arg6[%c24_40, %c0_41] : memref<72x8xf32, #tpu.memory_space<vmem>>, vector<8x8xf32>
    %cst_42 = arith.constant dense<0.000000e+00> : vector<8x512xf32>
    %92 = tpu.matmul %91, %90, %cst_42 {dimension_numbers = #tpu.dot_dimension_numbers<[1], [0], [0], [1], [0, 0, 1, 1], [], []>} : vector<8x8xf32>, vector<8x512xf32>, vector<8x512xf32> -> vector<8x512xf32>
    %93 = arith.addf %86, %92 : vector<8x512xf32>
    %c32_43 = arith.constant 32 : index
    %c0_44 = arith.constant 0 : index
    %94 = vector.load %arg6[%c32_43, %c0_44] : memref<72x8xf32, #tpu.memory_space<vmem>>, vector<8x8xf32>
    %cst_45 = arith.constant dense<0.000000e+00> : vector<8x512xf32>
    %95 = tpu.matmul %94, %66, %cst_45 {dimension_numbers = #tpu.dot_dimension_numbers<[1], [0], [0], [1], [0, 0, 1, 1], [], []>} : vector<8x8xf32>, vector<8x512xf32>, vector<8x512xf32> -> vector<8x512xf32>
    %96 = arith.addf %93, %95 : vector<8x512xf32>
    %c511_i32_46 = arith.constant 511 : i32
    %97 = tpu.dynamic_rotate %66 by %c511_i32_46 dim 1 : vector<8x512xf32>, i32 -> vector<8x512xf32>
    %98 = vector.extract_strided_slice %3 {offsets = [5, 0], sizes = [1, 512], strides = [1, 1]} : vector<9x512xf32> to vector<1x512xf32>
    %99 = vector.broadcast %98 : vector<1x512xf32> to vector<8x512xf32>
    %100 = arith.mulf %97, %99 : vector<8x512xf32>
    %c40_47 = arith.constant 40 : index
    %c0_48 = arith.constant 0 : index
    %101 = vector.load %arg6[%c40_47, %c0_48] : memref<72x8xf32, #tpu.memory_space<vmem>>, vector<8x8xf32>
    %cst_49 = arith.constant dense<0.000000e+00> : vector<8x512xf32>
    %102 = tpu.matmul %101, %100, %cst_49 {dimension_numbers = #tpu.dot_dimension_numbers<[1], [0], [0], [1], [0, 0, 1, 1], [], []>} : vector<8x8xf32>, vector<8x512xf32>, vector<8x512xf32> -> vector<8x512xf32>
    %103 = arith.addf %96, %102 : vector<8x512xf32>
    %c497_i32_50 = arith.constant 497 : i32
    %104 = tpu.dynamic_rotate %66 by %c497_i32_50 dim 1 : vector<8x512xf32>, i32 -> vector<8x512xf32>
    %105 = vector.extract_strided_slice %3 {offsets = [6, 0], sizes = [1, 512], strides = [1, 1]} : vector<9x512xf32> to vector<1x512xf32>
    %106 = vector.broadcast %105 : vector<1x512xf32> to vector<8x512xf32>
    %107 = arith.mulf %104, %106 : vector<8x512xf32>
    %c48_51 = arith.constant 48 : index
    %c0_52 = arith.constant 0 : index
    %108 = vector.load %arg6[%c48_51, %c0_52] : memref<72x8xf32, #tpu.memory_space<vmem>>, vector<8x8xf32>
    %cst_53 = arith.constant dense<0.000000e+00> : vector<8x512xf32>
    %109 = tpu.matmul %108, %107, %cst_53 {dimension_numbers = #tpu.dot_dimension_numbers<[1], [0], [0], [1], [0, 0, 1, 1], [], []>} : vector<8x8xf32>, vector<8x512xf32>, vector<8x512xf32> -> vector<8x512xf32>
    %110 = arith.addf %103, %109 : vector<8x512xf32>
    %c496_i32_54 = arith.constant 496 : i32
    %111 = tpu.dynamic_rotate %66 by %c496_i32_54 dim 1 : vector<8x512xf32>, i32 -> vector<8x512xf32>
    %112 = vector.extract_strided_slice %3 {offsets = [7, 0], sizes = [1, 512], strides = [1, 1]} : vector<9x512xf32> to vector<1x512xf32>
    %113 = vector.broadcast %112 : vector<1x512xf32> to vector<8x512xf32>
    %114 = arith.mulf %111, %113 : vector<8x512xf32>
    %c56_55 = arith.constant 56 : index
    %c0_56 = arith.constant 0 : index
    %115 = vector.load %arg6[%c56_55, %c0_56] : memref<72x8xf32, #tpu.memory_space<vmem>>, vector<8x8xf32>
    %cst_57 = arith.constant dense<0.000000e+00> : vector<8x512xf32>
    %116 = tpu.matmul %115, %114, %cst_57 {dimension_numbers = #tpu.dot_dimension_numbers<[1], [0], [0], [1], [0, 0, 1, 1], [], []>} : vector<8x8xf32>, vector<8x512xf32>, vector<8x512xf32> -> vector<8x512xf32>
    %117 = arith.addf %110, %116 : vector<8x512xf32>
    %c495_i32_58 = arith.constant 495 : i32
    %118 = tpu.dynamic_rotate %66 by %c495_i32_58 dim 1 : vector<8x512xf32>, i32 -> vector<8x512xf32>
    %119 = vector.extract_strided_slice %3 {offsets = [8, 0], sizes = [1, 512], strides = [1, 1]} : vector<9x512xf32> to vector<1x512xf32>
    %120 = vector.broadcast %119 : vector<1x512xf32> to vector<8x512xf32>
    %121 = arith.mulf %118, %120 : vector<8x512xf32>
    %c64_59 = arith.constant 64 : index
    %c0_60 = arith.constant 0 : index
    %122 = vector.load %arg6[%c64_59, %c0_60] : memref<72x8xf32, #tpu.memory_space<vmem>>, vector<8x8xf32>
    %cst_61 = arith.constant dense<0.000000e+00> : vector<8x512xf32>
    %123 = tpu.matmul %122, %121, %cst_61 {dimension_numbers = #tpu.dot_dimension_numbers<[1], [0], [0], [1], [0, 0, 1, 1], [], []>} : vector<8x8xf32>, vector<8x512xf32>, vector<8x512xf32> -> vector<8x512xf32>
    %124 = arith.addf %117, %123 : vector<8x512xf32>
    %c0_62 = arith.constant 0 : index
    %c0_63 = arith.constant 0 : index
    %125 = vector.load %arg7[%c0_62, %c0_63] : memref<8x1xf32, #tpu.memory_space<vmem>>, vector<8x1xf32>
    %126 = vector.broadcast %125 : vector<8x1xf32> to vector<8x512xf32>
    %127 = arith.addf %124, %126 : vector<8x512xf32>
    %c0_64 = arith.constant 0 : index
    %c0_65 = arith.constant 0 : index
    %128 = vector.load %arg8[%c0_64, %c0_65] : memref<8x512xf32, #tpu.memory_space<vmem>>, vector<8x512xf32>
    tpu.vector_store %arg8[%c0_64, %c0_65], %127 {strides = array<i32>} : memref<8x512xf32, #tpu.memory_space<vmem>>, vector<8x512xf32>,
    return
  }
  func.func @transform_0(%arg0: i32) -> (i32, i32) {
    %c0_i32 = arith.constant 0 : i32
    %c0_i32_0 = arith.constant 0 : i32
    %c0_i32_1 = arith.constant 0 : i32
    return %c0_i32, %c0_i32_0 : i32, i32
  }
  func.func @transform_1(%arg0: i32) -> (i32, i32) {
    %c0_i32 = arith.constant 0 : i32
    %c0_i32_0 = arith.constant 0 : i32
    %c0_i32_1 = arith.constant 0 : i32
    return %c0_i32, %c0_i32_0 : i32, i32
  }
  func.func @transform_2(%arg0: i32) -> (i32, i32) {
    %c0_i32 = arith.constant 0 : i32
    %c0_i32_0 = arith.constant 0 : i32
    %c0_i32_1 = arith.constant 0 : i32
    return %c0_i32, %c0_i32_0 : i32, i32
  }
  func.func @transform_3(%arg0: i32) -> (i32, i32) {
    %c0_i32 = arith.constant 0 : i32
    %c0_i32_0 = arith.constant 0 : i32
    %c0_i32_1 = arith.constant 0 : i32
    return %c0_i32, %c0_i32_0 : i32, i32
  }
  func.func @transform_4(%arg0: i32) -> (i32, i32) {
    %c0_i32 = arith.constant 0 : i32
    %c0_i32_0 = arith.constant 0 : i32
    %c0_i32_1 = arith.constant 0 : i32
    return %c0_i32, %c0_i32_0 : i32, i32
  }
  func.func @transform_5(%arg0: i32) -> (i32, i32) {
    %c0_i32 = arith.constant 0 : i32
    %c0_i32_0 = arith.constant 0 : i32
    %c0_i32_1 = arith.constant 0 : i32
    return %c0_i32, %c0_i32_0 : i32, i32
  }
  func.func @transform_6(%arg0: i32) -> (i32, i32) {
    %c0_i32 = arith.constant 0 : i32
    %c0_i32_0 = arith.constant 0 : i32
    %c0_i32_1 = arith.constant 0 : i32
    return %c0_i32, %c0_i32_0 : i32, i32
  }
  func.func @transform_7(%arg0: i32) -> (i32, i32) {
    %c0_i32 = arith.constant 0 : i32
    %c0_i32_0 = arith.constant 0 : i32
    %c0_i32_1 = arith.constant 0 : i32
    return %c0_i32, %c0_i32_0 : i32, i32
  }
}

</mosaic_0001>

<bundles_post_ra>
// kernel: up_9x9_forward.1
= control target key start
LH: loop header
LB: loop body
LE: loop exit
PB: predicated region body
PF: predicated region fallthrough
CT: control target
= control target key end

     0   :  { %12 = vsyncpa [#allocation3], 0  ;;  %s3573_s24 = smov [#allocation2]   ;;  %s4442_s0 = inlined_call_operand.vmem [shape: f32[8,128], index: 0, kind: input, shape index: {}]   ;;  %s4443_s1 = inlined_call_operand.vmem [shape: f32[128,512], index: 1, kind: input, shape index: {}]   ;;  %s4444_s2 = inlined_call_operand.hbm [shape: f32[9,512], index: 2, kind: input, shape index: {}]   ;;  %s4445_s3 = inlined_call_operand.vmem [shape: f32[72,8], index: 3, kind: input, shape index: {}]   ;;  %s4446_s4 = inlined_call_operand.vmem [shape: f32[8,1], index: 4, kind: input, shape index: {}]   ;;  %s4447_s5 = inlined_call_operand.vmem [shape: f32[72,8], index: 5, kind: input, shape index: {}]   ;;  %s4448_s6 = inlined_call_operand.vmem [shape: f32[8,1], index: 6, kind: input, shape index: {}]   ;;  %s4449_s7 = inlined_call_operand.vmem [shape: f32[8,512], index: 7, kind: output, shape index: {}]  }
   0x1   :  { %s22_s25 = sshll.u32 %s3573_s24, 4  ;;  %s3549_s28 = scalar_lea.hbm %s4444_s2, 1024  ;;  %s23_s25 = int_to_ptr.vmem [resolvable:$true] %s22_s25 }
   0x2   :  { %p3550_p0 = scmp.ne.s32.totalorder %s4444_s2, %s3549_s28  ;;  %p3553_p1 = scmp.lt.u32.totalorder %s3549_s28, %s4444_s2 }
   0x4   :  { %p3555_p2 = pnand %p3553_p1, %p3550_p0 }
   0x6   :  { %3558 = shalt.err (!%p3555_p2)
}
   0x7   :  { %s3559_s10 = scalar_lea.vmem %s23_s25, 1024  ;;  %p3564_p4 = scmp.lt.s32.totalorder %s23_s25, %s23_s25 }
   0x8   :  { %p3560_p3 = scmp.ne.s32.totalorder %s23_s25, %s3559_s10  ;;  %p3565_p5 = scmp.lt.s32.totalorder %s3559_s10, %s3559_s10 }
   0xa   :  { %p3566_p6 = por %p3565_p5, %p3564_p4 }
   0xc   :  { %p3567_p7 = pnand %p3566_p6, %p3560_p3 }
   0xe   :  { %3570 = shalt.err (!%p3567_p7)
}
   0xf   :  { %s3574_s11 = smov 512   ;;  %s3575_s12 = smov 32  }
  0x10   :  { %28 = dma.hbm_to_vmem [thread:$0]  %s4444_s2, 1024, %s23_s25, [#allocation3], %s3574_s11, %s3574_s11, %s3575_s12  }
  0x11   :  { %3571 = dma.done.wait [#allocation3], 1024  }
  0x12   :  { %3572 = vsyncadd [#allocation3], 4294966272  ;;  %v3576_v0 = vmov 0.0   ;;  %v42_v1 = vld [vmem:[%s4443_s1 + $0x8] sm:$0xff]  ;;  %v44_v3 = vld [vmem:[%s4443_s1 + $0x18] sm:$0xff]  ;;  %s3579_s24 = smov 15  }
  0x13   :  { %169 = vmatprep.mubr.f32.mxu0 %v3576_v0  ;;  %240 = vmatprep.mubr.f32.mxu1 %v3576_v0  ;;  %v46_v2 = vld [vmem:[%s4443_s1 + $0x28] sm:$0xff]  ;;  %v48_v5 = vld [vmem:[%s4443_s1 + $0x38] sm:$0xff]  ;;  %v41_v6 = vld [vmem:[%s4443_s1] sm:$0xff]  ;;  %s3580_s25 = smov 1   ;;  %s3581_s26 = smov 127   ;;  %vm325_vm2 = vcmask 64512  }
  0x14   :  { %v3407_v4 = vpack.c.bf16 %v46_v2, %v42_v1  ;;  %v45_v7 = vld [vmem:[%s4443_s1 + $0x20] sm:$0xff]  ;;  %v3439_v8 = vpack.c.bf16 %v48_v5, %v44_v3  ;;  %v43_v10 = vld [vmem:[%s4443_s1 + $0x10] sm:$0xff]  ;;  %v50_v12 = vld [vmem:[%s4443_s1 + $0x48] sm:$0xff]  ;;  %s3582_s27 = smov 113   ;;  %s3583_s28 = smov 112  }
  0x15   :  { %v3409_v9 = vpack.c.bf16 %v45_v7, %v41_v6  ;;  %v47_v11 = vld [vmem:[%s4443_s1 + $0x30] sm:$0xff]  ;;  %v54_v14 = vld [vmem:[%s4443_s1 + $0x68] sm:$0xff]  ;;  %v52_v15 = vld [vmem:[%s4443_s1 + $0x58] sm:$0xff]  ;;  %s3584_s29 = smov 111  }
  0x16   :  { %3408 = vmatprep.subr.bf16.mxu0 %v3407_v4  ;;  %v3441_v13 = vpack.c.bf16 %v47_v11, %v43_v10  ;;  %v56_v16 = vld [vmem:[%s4443_s1 + $0x78] sm:$0xff]  ;;  %3440 = vmatprep.subr.bf16.mxu1 %v3439_v8  ;;  %v3411_v17 = vpack.c.bf16 %v54_v14, %v50_v12  ;;  %v49_v19 = vld [vmem:[%s4443_s1 + $0x40] sm:$0xff]  ;;  %v51_v21 = vld [vmem:[%s4443_s1 + $0x50] sm:$0xff] }
  0x17   :  { %3410 = vmatpush1.bf16.msra.mxu0 %v3409_v9  ;;  %v3443_v18 = vpack.c.bf16 %v56_v16, %v52_v15  ;;  %v53_v20 = vld [vmem:[%s4443_s1 + $0x60] sm:$0xff]  ;;  %v55_v23 = vld [vmem:[%s4443_s1 + $0x70] sm:$0xff]  ;;  %v58_v24 = vld [vmem:[%s4443_s1 + $0x88] sm:$0xff] }
  0x18   :  { %3442 = vmatpush1.bf16.msra.mxu1 %v3441_v13  ;;  %v3413_v22 = vpack.c.bf16 %v53_v20, %v49_v19  ;;  %v62_v25 = vld [vmem:[%s4443_s1 + $0xa8] sm:$0xff]  ;;  %3412 = vmatprep.subr.bf16.mxu0 %v3411_v17  ;;  %v3445_v26 = vpack.c.bf16 %v55_v23, %v51_v21  ;;  %v60_v28 = vld [vmem:[%s4443_s1 + $0x98] sm:$0xff]  ;;  %v57_v30 = vld [vmem:[%s4443_s1 + $0x80] sm:$0xff] }
  0x19   :  { %3444 = vmatprep.subr.bf16.mxu1 %v3443_v18  ;;  %v3415_v27 = vpack.c.bf16 %v62_v25, %v58_v24  ;;  %v64_v29 = vld [vmem:[%s4443_s1 + $0xb8] sm:$0xff]  ;;  %v61_v32 = vld [vmem:[%s4443_s1 + $0xa0] sm:$0xff]  ;;  %v59_v33 = vld [vmem:[%s4443_s1 + $0x90] sm:$0xff] }
  0x1a   :  { %v3447_v31 = vpack.c.bf16 %v64_v29, %v60_v28  ;;  %v63_v34 = vld [vmem:[%s4443_s1 + $0xb0] sm:$0xff]  ;;  %v3417_v35 = vpack.c.bf16 %v61_v32, %v57_v30  ;;  %v66_v36 = vld [vmem:[%s4443_s1 + $0xc8] sm:$0xff]  ;;  %v68_v38 = vld [vmem:[%s4443_s1 + $0xd8] sm:$0xff] }
  0x1b   :  { %3414 = vmatpush1.bf16.msra.mxu0 %v3413_v22  ;;  %v70_v37 = vld [vmem:[%s4443_s1 + $0xe8] sm:$0xff]  ;;  %v3449_v39 = vpack.c.bf16 %v63_v34, %v59_v33  ;;  %v72_v41 = vld [vmem:[%s4443_s1 + $0xf8] sm:$0xff]  ;;  %v65_v42 = vld [vmem:[%s4443_s1 + $0xc0] sm:$0xff] }
  0x1c   :  { %3446 = vmatpush1.bf16.msra.mxu1 %v3445_v26  ;;  %3416 = vmatprep.subr.bf16.mxu0 %v3415_v27  ;;  %v3419_v40 = vpack.c.bf16 %v70_v37, %v66_v36  ;;  %v69_v43 = vld [vmem:[%s4443_s1 + $0xe0] sm:$0xff]  ;;  %v3451_v44 = vpack.c.bf16 %v72_v41, %v68_v38  ;;  %v67_v45 = vld [vmem:[%s4443_s1 + $0xd0] sm:$0xff]  ;;  %v74_v47 = vld [vmem:[%s4443_s1 + $0x108] sm:$0xff]  ;;  %v263_v41 = vlaneseq }
  0x1d   :  { %3448 = vmatprep.subr.bf16.mxu1 %v3447_v31  ;;  %v71_v46 = vld [vmem:[%s4443_s1 + $0xf0] sm:$0xff]  ;;  %v78_v48 = vld [vmem:[%s4443_s1 + $0x128] sm:$0xff]  ;;  %v76_v49 = vld [vmem:[%s4443_s1 + $0x118] sm:$0xff]  ;;  %v3421_v51 = vpack.c.bf16 %v69_v43, %v65_v42 }
  0x1e   :  { %v80_v50 = vld [vmem:[%s4443_s1 + $0x138] sm:$0xff]  ;;  %v3453_v52 = vpack.c.bf16 %v71_v46, %v67_v45  ;;  %v3423_v53 = vpack.c.bf16 %v78_v48, %v74_v47  ;;  %v73_v54 = vld [vmem:[%s4443_s1 + $0x100] sm:$0xff]  ;;  %v75_v56 = vld [vmem:[%s4443_s1 + $0x110] sm:$0xff]  ;;  %v3912_v42 = vshrl.u32 %v263_v41, 7  ;;  %v3914_v43 = vand.u32 127, %v263_v41 }
  0x1f   :  { %3418 = vmatpush1.bf16.msra.mxu0 %v3417_v35  ;;  %v77_v55 = vld [vmem:[%s4443_s1 + $0x120] sm:$0xff]  ;;  %v3455_v57 = vpack.c.bf16 %v80_v50, %v76_v49  ;;  %v79_v58 = vld [vmem:[%s4443_s1 + $0x130] sm:$0xff]  ;;  %v82_v59 = vld [vmem:[%s4443_s1 + $0x148] sm:$0xff] }
  0x20   :  { %3450 = vmatpush1.bf16.msra.mxu1 %v3449_v39  ;;  %3420 = vmatprep.subr.bf16.mxu0 %v3419_v40  ;;  %v86_v60 = vld [vmem:[%s4443_s1 + $0x168] sm:$0xff]  ;;  %v84_v61 = vld [vmem:[%s4443_s1 + $0x158] sm:$0xff]  ;;  %v3425_v63 = vpack.c.bf16 %v77_v55, %v73_v54  ;;  %v3457_v1 = vpack.c.bf16 %v79_v58, %v75_v56  ;;  %v81_v3 = vld [vmem:[%s4443_s1 + $0x140] sm:$0xff]  ;;  %v3585_v40 = vmov 0   ;;  %vm299_vm0 = vcmp.lt.s32.totalorder %v3914_v43, 16 }
  0x21   :  { %3452 = vmatprep.subr.bf16.mxu1 %v3451_v44  ;;  %v88_v62 = vld [vmem:[%s4443_s1 + $0x178] sm:$0xff]  ;;  %v3427_v2 = vpack.c.bf16 %v86_v60, %v82_v59  ;;  %v85_v4 = vld [vmem:[%s4443_s1 + $0x160] sm:$0xff]  ;;  %v83_v5 = vld [vmem:[%s4443_s1 + $0x150] sm:$0xff]  ;;  %3548 = vset.pattern.permute.xlu0 %v3585_v40  ;;  %v306_v44 = vsub.s32 1, %v3912_v42  ;;  %v272_v55 = vsub.s32 0, %v3912_v42  ;;  %vm265_vm1 = vcmp.lt.s32.totalorder %v3914_v43, 17 }
  0x22   :  { %v3459_v6 = vpack.c.bf16 %v88_v62, %v84_v61  ;;  %v87_v7 = vld [vmem:[%s4443_s1 + $0x170] sm:$0xff]  ;;  %v90_v8 = vld [vmem:[%s4443_s1 + $0x188] sm:$0xff]  ;;  %v92_v10 = vld [vmem:[%s4443_s1 + $0x198] sm:$0xff]  ;;  %v3429_v12 = vpack.c.bf16 %v85_v4, %v81_v3  ;;  %vm624_vm3 = vcmp.lt.s32.totalorder %v3914_v43, 15  ;;  %vm807_vm4 = vcmp.lt.s32.totalorder %v3914_v43, 1 }
  0x23   :  { %3422 = vmatpush1.bf16.msra.mxu0 %v3421_v51  ;;  %v94_v9 = vld [vmem:[%s4443_s1 + $0x1a8] sm:$0xff]  ;;  %v96_v11 = vld [vmem:[%s4443_s1 + $0x1b8] sm:$0xff]  ;;  %v3461_v13 = vpack.c.bf16 %v87_v7, %v83_v5  ;;  %v89_v15 = vld [vmem:[%s4443_s1 + $0x180] sm:$0xff]  ;;  %vm1140_vm5 = vcmp.lt.s32.totalorder %v3914_v43, 127  ;;  %vm1323_vm6 = vcmp.lt.s32.totalorder %v3914_v43, 113  ;;  %vm1506_vm7 = vcmp.lt.s32.totalorder %v3914_v43, 112 }
  0x24   :  { %3454 = vmatpush1.bf16.msra.mxu1 %v3453_v52  ;;  %3424 = vmatprep.subr.bf16.mxu0 %v3423_v53  ;;  %v3431_v14 = vpack.c.bf16 %v94_v9, %v90_v8  ;;  %v93_v16 = vld [vmem:[%s4443_s1 + $0x1a0] sm:$0xff]  ;;  %v91_v17 = vld [vmem:[%s4443_s1 + $0x190] sm:$0xff]  ;;  %v3463_v18 = vpack.c.bf16 %v96_v11, %v92_v10  ;;  %v98_v20 = vld [vmem:[%s4443_s1 + $0x1c8] sm:$0xff]  ;;  %vm1689_vm8 = vcmp.lt.s32.totalorder %v3914_v43, 111 }
  0x25   :  { %3456 = vmatprep.subr.bf16.mxu1 %v3455_v57  ;;  %v95_v19 = vld [vmem:[%s4443_s1 + $0x1b0] sm:$0xff]  ;;  %v102_v21 = vld [vmem:[%s4443_s1 + $0x1e8] sm:$0xff]  ;;  %v100_v22 = vld [vmem:[%s4443_s1 + $0x1d8] sm:$0xff]  ;;  %v3433_v24 = vpack.c.bf16 %v93_v16, %v89_v15 }
  0x26   :  { %v104_v23 = vld [vmem:[%s4443_s1 + $0x1f8] sm:$0xff]  ;;  %v3465_v25 = vpack.c.bf16 %v95_v19, %v91_v17  ;;  %v3435_v26 = vpack.c.bf16 %v102_v21, %v98_v20  ;;  %v97_v27 = vld [vmem:[%s4443_s1 + $0x1c0] sm:$0xff]  ;;  %v99_v30 = vld [vmem:[%s4443_s1 + $0x1d0] sm:$0xff] }
  0x27   :  { %3426 = vmatpush1.bf16.msra.mxu0 %v3425_v63  ;;  %v101_v28 = vld [vmem:[%s4443_s1 + $0x1e0] sm:$0xff]  ;;  %v3467_v29 = vpack.c.bf16 %v104_v23, %v100_v22  ;;  %v103_v31 = vld [vmem:[%s4443_s1 + $0x1f0] sm:$0xff]  ;;  %s3577_s1 = smov 16   ;;  %v3917_v45 = vld [vmem:[#allocation2 + $0x8] sm:$0xff] }
  0x28   :  { %3458 = vmatpush1.bf16.msra.mxu1 %v3457_v1  ;;  %3428 = vmatprep.subr.bf16.mxu0 %v3427_v2  ;;  %v3437_v32 = vpack.c.bf16 %v101_v28, %v97_v27  ;;  %v3469_v33 = vpack.c.bf16 %v103_v31, %v99_v30  ;;  %v40_v34 = vld [vmem:[%s4442_s0] sm:$0xff]  ;;  %s3578_s0 = smov 17   ;;  %v3919_v46 = vld [vmem:[#allocation2 + $0x10] sm:$0xff]  ;;  %v3923_v49 = vld [vmem:[#allocation2 + $0x18] sm:$0xff]  ;;  %v3927_v51 = vrot.slane %v3917_v45, %v306_v44  ;;  %v814_v30 = vsub.s32 3, %v3912_v42 }
  0x29   :  { %3460 = vmatprep.subr.bf16.mxu1 %v3459_v6  ;;  %v1864_v39 = vld [vmem:[%s4446_s4] sm:$0xff]  ;;  %v3930_v52 = vrot.slane %v3919_v46, %v306_v44  ;;  %v3936_v54 = vrot.slane %v3923_v49, %v306_v44  ;;  %v3953_v3 = vrot.slane %v3917_v45, %v272_v55  ;;  %v324_v4 = vld [vmem:[%s4445_s3 + $0x8] sm:$0xff]  ;;  %v3962_v8 = vrot.slane %v3919_v46, %v272_v55 }
  0x2a   :  { %v3921_v48 = vld [vmem:[#allocation2] sm:$0xff]  ;;  %v3970_v11 = vrot.slane %v3923_v49, %v272_v55 }
  0x2b   :  { %3430 = vmatpush1.bf16.msra.mxu0 %v3429_v12  ;;  %v3933_v53 = vrot.slane %v3921_v48, %v306_v44  ;;  %v3967_v10 = vrot.slane %v3921_v48, %v272_v55  ;;  %v631_v12 = vsub.s32 2, %v3912_v42  ;;  %v290_v22 = vld [vmem:[%s4445_s3] sm:$0xff] }
  0x2c   :  { %3462 = vmatpush1.bf16.msra.mxu1 %v3461_v13  ;;  %3432 = vmatprep.subr.bf16.mxu0 %v3431_v14  ;;  %v3198_v43 = vld [vmem:[%s4447_s5 + $0x40] sm:$0xff] }
  0x2d   :  { %3464 = vmatprep.subr.bf16.mxu1 %v3463_v18  ;;  %v3986_v21 = vrot.slane %v3917_v45, %v631_v12  ;;  %v4000_v28 = vrot.slane %v3921_v48, %v631_v12 }
  0x2f   :  { %3434 = vmatpush1.bf16.msra.mxu0 %v3433_v24 }
  0x30   :  { %3466 = vmatpush1.bf16.msra.mxu1 %v3465_v25  ;;  %3436 = vmatprep.subr.bf16.mxu0 %v3435_v26  ;;  %v3995_v26 = vrot.slane %v3919_v46, %v631_v12 }
  0x31   :  { %3468 = vmatprep.subr.bf16.mxu1 %v3467_v29  ;;  %v4003_v29 = vrot.slane %v3923_v49, %v631_v12 }
  0x33   :  { %3438 = vmatpush1.bf16.msra.mxu0 %v3437_v32 }
  0x34   :  { %3470 = vmatpush1.bf16.msra.mxu1 %v3469_v33 }
  0x36   :  { %170 = vmatmul.mubr.f32.vlgmr.msra.gmra.mrb[0].mxu0 %v40_v34 }
  0x37   :  { %241 = vmatmul.mubr.f32.vlgmr.msra.gmra.mrb[0].mxu1 %v40_v34  ;;  %393 = vmatprep.mubr.f32.mxu0 %v3576_v0 }
  0x38   :  { %464 = vmatprep.mubr.f32.mxu1 %v3576_v0 }
 0x109   :  { %v3837_v35 = vpop.f32.mrb[0].mxu0 }
 0x10a   :  { %v3839_v36 = vpop.f32.mrb[0].mxu1  ;;  %291 = vrot.lane.b32.xlu0 %v3837_v35, %s3577_s1  ;;  %v3843_v37 = vpop.f32.mrb[1].mxu0 }
 0x10b   :  { %295 = vrot.lane.b32.xlu1 %v3839_v36, %s3577_s1  ;;  %v3847_v38 = vpop.f32.mrb[1].mxu1 }
 0x10e   :  { %293 = vrot.lane.b32.xlu0 %v3843_v37, %s3577_s1 }
 0x10f   :  { %297 = vrot.lane.b32.xlu1 %v3847_v38, %s3577_s1 }
 0x112   :  { %255 = vrot.lane.b32.xlu0 %v3837_v35, %s3578_s0 }
 0x113   :  { %257 = vrot.lane.b32.xlu1 %v3843_v37, %s3578_s0 }
 0x116   :  { %259 = vrot.lane.b32.xlu0 %v3839_v36, %s3578_s0 }
 0x117   :  { %261 = vrot.lane.b32.xlu1 %v3847_v38, %s3578_s0 }
 0x11a   :  { %616 = vrot.lane.b32.xlu0 %v3837_v35, %s3579_s24 }
 0x11b   :  { %618 = vrot.lane.b32.xlu1 %v3843_v37, %s3579_s24 }
 0x11e   :  { %620 = vrot.lane.b32.xlu0 %v3839_v36, %s3579_s24 }
 0x11f   :  { %622 = vrot.lane.b32.xlu1 %v3847_v38, %s3579_s24 }
 0x122   :  { %799 = vrot.lane.b32.xlu0 %v3837_v35, %s3580_s25 }
 0x123   :  { %801 = vrot.lane.b32.xlu1 %v3843_v37, %s3580_s25 }
 0x126   :  { %803 = vrot.lane.b32.xlu0 %v3839_v36, %s3580_s25 }
 0x127   :  { %805 = vrot.lane.b32.xlu1 %v3847_v38, %s3580_s25 }
 0x12a   :  { %1132 = vrot.lane.b32.xlu0 %v3837_v35, %s3581_s26 }
 0x12b   :  { %1134 = vrot.lane.b32.xlu1 %v3843_v37, %s3581_s26 }
 0x12e   :  { %1136 = vrot.lane.b32.xlu0 %v3839_v36, %s3581_s26 }
 0x12f   :  { %1138 = vrot.lane.b32.xlu1 %v3847_v38, %s3581_s26 }
 0x132   :  { %1315 = vrot.lane.b32.xlu0 %v3837_v35, %s3582_s27 }
 0x133   :  { %1317 = vrot.lane.b32.xlu1 %v3843_v37, %s3582_s27 }
 0x136   :  { %1319 = vrot.lane.b32.xlu0 %v3839_v36, %s3582_s27 }
 0x137   :  { %1321 = vrot.lane.b32.xlu1 %v3847_v38, %s3582_s27 }
 0x13a   :  { %1498 = vrot.lane.b32.xlu0 %v3837_v35, %s3583_s28 }
 0x13b   :  { %1500 = vrot.lane.b32.xlu1 %v3843_v37, %s3583_s28 }
 0x13e   :  { %1502 = vrot.lane.b32.xlu0 %v3839_v36, %s3583_s28 }
 0x13f   :  { %1504 = vrot.lane.b32.xlu1 %v3847_v38, %s3583_s28 }
 0x142   :  { %1681 = vrot.lane.b32.xlu0 %v3837_v35, %s3584_s29 }
 0x143   :  { %1683 = vrot.lane.b32.xlu1 %v3843_v37, %s3584_s29 }
 0x146   :  { %1685 = vrot.lane.b32.xlu0 %v3839_v36, %s3584_s29 }
 0x147   :  { %1687 = vrot.lane.b32.xlu1 %v3847_v38, %s3584_s29 }
 0x14a   :  { %1867 = vperm.xlu0 %3548, %v1864_v39  }
 0x17c   :  { %v292_v47 = vpop.permute.xlu0 %291 }
 0x17d   :  { %v296_v50 = vpop.permute.xlu1 %295 }
 0x180   :  { %v294_v56 = vpop.permute.xlu0 %293 }
 0x181   :  { %v298_v57 = vpop.permute.xlu1 %297  ;;  %v301_v58 = vsel %vm299_vm0, %v294_v56, %v296_v50  ;;  %v302_v59 = vsel %vm299_vm0, %v292_v47, %v294_v56 }
 0x182   :  { %v300_v60 = vsel %vm299_vm0, %v296_v50, %v298_v57  ;;  %v303_v61 = vsel %vm299_vm0, %v298_v57, %v292_v47  ;;  %v321_v62 = vmul.f32 %v3927_v51, %v302_v59  ;;  %v322_v63 = vmul.f32 %v3930_v52, %v301_v58  ;;  %v649_v50 = vld [vmem:[%s4445_s3 + $0x10] sm:$0xff] }
 0x183   :  { %v320_v1 = vmul.f32 %v3933_v53, %v303_v61  ;;  %v323_v2 = vmul.f32 %v3936_v54, %v300_v60  ;;  %v4019_v47 = vrot.slane %v3917_v45, %v814_v30  ;;  %v4028_v58 = vrot.slane %v3919_v46, %v814_v30 }
 0x184   :  { %329 = vmatprep.subr.mxu0 %v321_v62  ;;  %v256_v5 = vpop.permute.xlu0 %255  ;;  %v4033_v60 = vrot.slane %v3921_v48, %v814_v30  ;;  %v4036_v61 = vrot.slane %v3923_v49, %v814_v30 }
 0x185   :  { %400 = vmatprep.subr.mxu1 %v323_v2  ;;  %v258_v6 = vpop.permute.xlu1 %257  ;;  %330 = vmatpush1.msra.mxu0 %v320_v1 }
 0x186   :  { %v268_v7 = vsel %vm265_vm1, %v256_v5, %v258_v6  ;;  %401 = vmatpush1.msra.mxu1 %v322_v63  ;;  %3367 = vmatmul.mubr.msk.f32.vlgmr.msra.gmra.mrb[2].mxu0 %vm325_vm2, %v324_v4 }
 0x187   :  { %v287_v9 = vmul.f32 %v3953_v3, %v268_v7  ;;  %3368 = vmatmul.mubr.msk.f32.vlgmr.msra.gmra.mrb[2].mxu1 %vm325_vm2, %v324_v4  ;;  %538 = vmatprep.mubr.f32.mxu0 %v3576_v0 }
 0x188   :  { %v260_v13 = vpop.permute.xlu0 %259  ;;  %609 = vmatprep.mubr.f32.mxu1 %v3576_v0 }
 0x189   :  { %v262_v14 = vpop.permute.xlu1 %261  ;;  %474 = vmatprep.subr.mxu0 %v287_v9  ;;  %v267_v15 = vsel %vm265_vm1, %v258_v6, %v260_v13  ;;  %v1147_v9 = vsub.s32 5, %v3912_v42 }
 0x18a   :  { %v269_v16 = vsel %vm265_vm1, %v262_v14, %v256_v5  ;;  %v266_v17 = vsel %vm265_vm1, %v260_v13, %v262_v14  ;;  %v288_v18 = vmul.f32 %v3962_v8, %v267_v15  ;;  %v832_v13 = vld [vmem:[%s4445_s3 + $0x18] sm:$0xff] }
 0x18b   :  { %v286_v19 = vmul.f32 %v3967_v10, %v269_v16  ;;  %v289_v20 = vmul.f32 %v3970_v11, %v266_v17  ;;  %v4055_v15 = vrot.slane %v3917_v45, %v1147_v9  ;;  %v4060_v16 = vrot.slane %v3923_v49, %v1147_v9 }
 0x18c   :  { %v617_v23 = vpop.permute.xlu0 %616 }
 0x18d   :  { %v619_v24 = vpop.permute.xlu1 %618  ;;  %475 = vmatpush1.msra.mxu0 %v286_v19  ;;  %545 = vmatprep.subr.mxu1 %v289_v20  ;;  %v4070_v19 = vrot.slane %v3921_v48, %v1147_v9 }
 0x18e   :  { %v627_v25 = vsel %vm624_vm3, %v617_v23, %v619_v24  ;;  %546 = vmatpush1.msra.mxu1 %v288_v18  ;;  %3369 = vmatmul.mubr.msk.f32.vlgmr.msra.gmra.mrb[2].mxu0 %vm325_vm2, %v290_v22 }
 0x18f   :  { %v646_v27 = vmul.f32 %v3986_v21, %v627_v25  ;;  %3370 = vmatmul.mubr.msk.f32.vlgmr.msra.gmra.mrb[2].mxu1 %vm325_vm2, %v290_v22  ;;  %717 = vmatprep.mubr.f32.mxu0 %v3576_v0  ;;  %v4075_v22 = vrot.slane %v3919_v46, %v1147_v9 }
 0x190   :  { %v621_v31 = vpop.permute.xlu0 %620  ;;  %788 = vmatprep.mubr.f32.mxu1 %v3576_v0 }
 0x191   :  { %v623_v32 = vpop.permute.xlu1 %622  ;;  %653 = vmatprep.subr.mxu0 %v646_v27  ;;  %v626_v33 = vsel %vm624_vm3, %v619_v24, %v621_v31  ;;  %v1330_v24 = vsub.s32 6, %v3912_v42  ;;  %v982_v27 = vld [vmem:[%s4445_s3 + $0x20] sm:$0xff] }
 0x192   :  { %v628_v34 = vsel %vm624_vm3, %v623_v32, %v617_v23  ;;  %v625_v39 = vsel %vm624_vm3, %v621_v31, %v623_v32  ;;  %v647_v40 = vmul.f32 %v3995_v26, %v626_v33 }
 0x193   :  { %v645_v41 = vmul.f32 %v4000_v28, %v628_v34  ;;  %v648_v44 = vmul.f32 %v4003_v29, %v625_v39  ;;  %v4091_v33 = vrot.slane %v3917_v45, %v1330_v24  ;;  %v4096_v34 = vrot.slane %v3923_v49, %v1330_v24 }
 0x194   :  { %v800_v55 = vpop.permute.xlu0 %799 }
 0x195   :  { %v802_v56 = vpop.permute.xlu1 %801  ;;  %654 = vmatpush1.msra.mxu0 %v645_v41  ;;  %724 = vmatprep.subr.mxu1 %v648_v44  ;;  %v4104_v44 = vrot.slane %v3921_v48, %v1330_v24 }
 0x196   :  { %v810_v57 = vsel %vm807_vm4, %v800_v55, %v802_v56  ;;  %725 = vmatpush1.msra.mxu1 %v647_v40  ;;  %3371 = vmatmul.mubr.msk.f32.vlgmr.msra.gmra.mrb[2].mxu0 %vm325_vm2, %v649_v50 }
 0x197   :  { %v829_v59 = vmul.f32 %v4019_v47, %v810_v57  ;;  %3372 = vmatmul.mubr.msk.f32.vlgmr.msra.gmra.mrb[2].mxu1 %vm325_vm2, %v649_v50  ;;  %900 = vmatprep.mubr.f32.mxu0 %v3576_v0 }
 0x198   :  { %v804_v62 = vpop.permute.xlu0 %803  ;;  %971 = vmatprep.mubr.f32.mxu1 %v3576_v0 }
 0x199   :  { %v806_v63 = vpop.permute.xlu1 %805  ;;  %836 = vmatprep.subr.mxu0 %v829_v59  ;;  %v809_v1 = vsel %vm807_vm4, %v802_v56, %v804_v62 }
 0x19a   :  { %v811_v2 = vsel %vm807_vm4, %v806_v63, %v800_v55  ;;  %v808_v4 = vsel %vm807_vm4, %v804_v62, %v806_v63  ;;  %v830_v5 = vmul.f32 %v4028_v58, %v809_v1  ;;  %v4109_v55 = vrot.slane %v3919_v46, %v1330_v24  ;;  %v4160_v24 = vld [vmem:[#allocation2 + $0x38] ss:$0 sm:$0xff] }
 0x19b   :  { %v828_v6 = vmul.f32 %v4033_v60, %v811_v2  ;;  %v831_v7 = vmul.f32 %v4036_v61, %v808_v4  ;;  %v1513_v63 = vsub.s32 7, %v3912_v42  ;;  %v1165_v2 = vld [vmem:[%s4445_s3 + $0x28] sm:$0xff] }
 0x19c   :  { %v1133_v12 = vpop.permute.xlu0 %1132 }
 0x19d   :  { %v1135_v14 = vpop.permute.xlu1 %1134  ;;  %837 = vmatpush1.msra.mxu0 %v828_v6  ;;  %907 = vmatprep.subr.mxu1 %v831_v7  ;;  %v4124_v7 = vrot.slane %v3917_v45, %v1513_v63  ;;  %v4129_v42 = vrot.slane %v3923_v49, %v1513_v63  ;;  %v4137_v45 = vrot.slane %v3921_v48, %v1513_v63  ;;  %v1348_v48 = vld [vmem:[%s4445_s3 + $0x30] sm:$0xff] }
 0x19e   :  { %908 = vmatpush1.msra.mxu1 %v830_v5  ;;  %986 = vmatprep.subr.mxu0 %v3843_v37 }
 0x19f   :  { %3373 = vmatmul.mubr.msk.f32.vlgmr.msra.gmra.mrb[2].mxu0 %vm325_vm2, %v832_v13  ;;  %3374 = vmatmul.mubr.msk.f32.vlgmr.msra.gmra.mrb[2].mxu1 %vm325_vm2, %v832_v13 }
 0x1a0   :  { %987 = vmatpush1.msra.mxu0 %v3837_v35  ;;  %1057 = vmatprep.subr.mxu1 %v3847_v38  ;;  %v1137_v17 = vpop.permute.xlu0 %1136 }
 0x1a1   :  { %1058 = vmatpush1.msra.mxu1 %v3839_v36  ;;  %v1139_v37 = vpop.permute.xlu1 %1138  ;;  %v1142_v18 = vsel %vm1140_vm5, %v1135_v14, %v1137_v17  ;;  %1050 = vmatprep.mubr.f32.mxu0 %v3576_v0  ;;  %v1143_v36 = vsel %vm1140_vm5, %v1133_v12, %v1135_v14  ;;  %v4142_v14 = vrot.slane %v3919_v46, %v1513_v63  ;;  %v1714_v63 = vld [vmem:[%s4445_s3 + $0x40] sm:$0xff] }
 0x1a2   :  { %v1144_v20 = vsel %vm1140_vm5, %v1139_v37, %v1133_v12  ;;  %v1162_v35 = vmul.f32 %v4055_v15, %v1142_v18  ;;  %1121 = vmatprep.mubr.f32.mxu1 %v3576_v0  ;;  %v1141_v23 = vsel %vm1140_vm5, %v1137_v17, %v1139_v37  ;;  %v1161_v31 = vmul.f32 %v4070_v19, %v1143_v36 }
 0x1a3   :  { %v1164_v38 = vmul.f32 %v4060_v16, %v1144_v20  ;;  %v1163_v32 = vmul.f32 %v4075_v22, %v1141_v23  ;;  %v4157_v23 = vld [vmem:[#allocation2 + $0x28] ss:$0 sm:$0xff] }
 0x1a4   :  { %1169 = vmatprep.subr.mxu0 %v1162_v35  ;;  %v1316_v25 = vpop.permute.xlu0 %1315 }
 0x1a5   :  { %v1318_v30 = vpop.permute.xlu1 %1317  ;;  %1240 = vmatprep.subr.mxu1 %v1164_v38 }
 0x1a6   :  { %v1326_v57 = vsel %vm1323_vm6, %v1316_v25, %v1318_v30 }
 0x1a7   :  { %3375 = vmatmul.mubr.msk.f32.vlgmr.msra.gmra.mrb[2].mxu0 %vm325_vm2, %v982_v27  ;;  %3376 = vmatmul.mubr.msk.f32.vlgmr.msra.gmra.mrb[2].mxu1 %vm325_vm2, %v982_v27  ;;  %v1344_v5 = vmul.f32 %v4104_v44, %v1326_v57  ;;  %v1531_v57 = vld [vmem:[%s4445_s3 + $0x38] sm:$0xff] }
 0x1a8   :  { %1170 = vmatpush1.msra.mxu0 %v1161_v31  ;;  %1241 = vmatpush1.msra.mxu1 %v1163_v32  ;;  %v1320_v39 = vpop.permute.xlu0 %1319 }
 0x1a9   :  { %v1322_v40 = vpop.permute.xlu1 %1321  ;;  %v1325_v41 = vsel %vm1323_vm6, %v1318_v30, %v1320_v39  ;;  %1233 = vmatprep.mubr.f32.mxu0 %v3576_v0  ;;  %1304 = vmatprep.mubr.f32.mxu1 %v3576_v0 }
 0x1aa   :  { %v1327_v50 = vsel %vm1323_vm6, %v1322_v40, %v1316_v25  ;;  %v1345_v56 = vmul.f32 %v4091_v33, %v1325_v41  ;;  %v1324_v62 = vsel %vm1323_vm6, %v1320_v39, %v1322_v40  ;;  %v4169_v39 = vld [vmem:[#allocation2 + $0x20] ss:$0 sm:$0xff] }
 0x1ab   :  { %v1347_v59 = vmul.f32 %v4096_v34, %v1327_v50  ;;  %v1346_v6 = vmul.f32 %v4109_v55, %v1324_v62  ;;  %v4174_v50 = vld [vmem:[#allocation2 + $0x30] ss:$0 sm:$0xff] }
 0x1ac   :  { %1352 = vmatprep.subr.mxu0 %v1345_v56  ;;  %v1499_v1 = vpop.permute.xlu0 %1498 }
 0x1ad   :  { %v1501_v4 = vpop.permute.xlu1 %1500  ;;  %1423 = vmatprep.subr.mxu1 %v1347_v59 }
 0x1ae   :  { %v1509_v37 = vsel %vm1506_vm7, %v1499_v1, %v1501_v4 }
 0x1af   :  { %3377 = vmatmul.mubr.msk.f32.vlgmr.msra.gmra.mrb[2].mxu0 %vm325_vm2, %v1165_v2  ;;  %3378 = vmatmul.mubr.msk.f32.vlgmr.msra.gmra.mrb[2].mxu1 %vm325_vm2, %v1165_v2  ;;  %v1527_v46 = vmul.f32 %v4137_v45, %v1509_v37 }
 0x1b0   :  { %1353 = vmatpush1.msra.mxu0 %v1344_v5  ;;  %1424 = vmatpush1.msra.mxu1 %v1346_v6  ;;  %v1503_v9 = vpop.permute.xlu0 %1502 }
 0x1b1   :  { %v1505_v12 = vpop.permute.xlu1 %1504  ;;  %v1508_v13 = vsel %vm1506_vm7, %v1501_v4, %v1503_v9  ;;  %1416 = vmatprep.mubr.f32.mxu0 %v3576_v0  ;;  %1487 = vmatprep.mubr.f32.mxu1 %v3576_v0 }
 0x1b2   :  { %v1510_v49 = vsel %vm1506_vm7, %v1505_v12, %v1499_v1  ;;  %v1528_v17 = vmul.f32 %v4124_v7, %v1508_v13  ;;  %v1507_v20 = vsel %vm1506_vm7, %v1503_v9, %v1505_v12 }
 0x1b3   :  { %v1530_v18 = vmul.f32 %v4129_v42, %v1510_v49  ;;  %v1529_v38 = vmul.f32 %v4142_v14, %v1507_v20 }
 0x1b4   :  { %1535 = vmatprep.subr.mxu0 %v1528_v17  ;;  %v1682_v35 = vpop.permute.xlu0 %1681 }
 0x1b5   :  { %v1684_v36 = vpop.permute.xlu1 %1683  ;;  %1606 = vmatprep.subr.mxu1 %v1530_v18 }
 0x1b6   :  { %v1692_v40 = vsel %vm1689_vm8, %v1682_v35, %v1684_v36 }
 0x1b7   :  { %3379 = vmatmul.mubr.msk.f32.vlgmr.msra.gmra.mrb[2].mxu0 %vm325_vm2, %v1348_v48  ;;  %3380 = vmatmul.mubr.msk.f32.vlgmr.msra.gmra.mrb[2].mxu1 %vm325_vm2, %v1348_v48  ;;  %v1710_v59 = vmul.f32 %v4169_v39, %v1692_v40 }
 0x1b8   :  { %1536 = vmatpush1.msra.mxu0 %v1527_v46  ;;  %1607 = vmatpush1.msra.mxu1 %v1529_v38  ;;  %v1686_v25 = vpop.permute.xlu0 %1685 }
 0x1b9   :  { %v1688_v27 = vpop.permute.xlu1 %1687  ;;  %v1691_v30 = vsel %vm1689_vm8, %v1684_v36, %v1686_v25  ;;  %1599 = vmatprep.mubr.f32.mxu0 %v3576_v0  ;;  %1670 = vmatprep.mubr.f32.mxu1 %v3576_v0 }
 0x1ba   :  { %v1693_v31 = vsel %vm1689_vm8, %v1688_v27, %v1682_v35  ;;  %v1711_v32 = vmul.f32 %v4157_v23, %v1691_v30  ;;  %v1690_v56 = vsel %vm1689_vm8, %v1686_v25, %v1688_v27  ;;  %v3348_v35 = vld [vmem:[%s4448_s6] sm:$0xff] }
 0x1bb   :  { %v1713_v41 = vmul.f32 %v4160_v24, %v1693_v31  ;;  %v1712_v62 = vmul.f32 %v4174_v50, %v1690_v56 }
 0x1bc   :  { %1718 = vmatprep.subr.mxu0 %v1711_v32 }
 0x1bd   :  { %1789 = vmatprep.subr.mxu1 %v1713_v41 }
 0x1bf   :  { %3381 = vmatmul.mubr.msk.f32.vlgmr.msra.gmra.mrb[2].mxu0 %vm325_vm2, %v1531_v57  ;;  %3382 = vmatmul.mubr.msk.f32.vlgmr.msra.gmra.mrb[2].mxu1 %vm325_vm2, %v1531_v57 }
 0x1c0   :  { %1719 = vmatpush1.msra.mxu0 %v1710_v59  ;;  %1790 = vmatpush1.msra.mxu1 %v1712_v62 }
 0x1c1   :  { %1782 = vmatprep.mubr.f32.mxu0 %v3576_v0  ;;  %1853 = vmatprep.mubr.f32.mxu1 %v3576_v0 }
 0x1c7   :  { %3387 = vmatmul.mubr.msk.f32.vlgmr.msra.gmra.mrb[2].mxu0 %vm325_vm2, %v1714_v63  ;;  %3388 = vmatmul.mubr.msk.f32.vlgmr.msra.gmra.mrb[2].mxu1 %vm325_vm2, %v1714_v63 }
 0x1c8   :  { %1979 = vmatprep.mubr.f32.mxu0 %v3576_v0  ;;  %2050 = vmatprep.mubr.f32.mxu1 %v3576_v0 }
 0x1c9   :  { %v1868_v1 = vpop.permute.xlu0 %1867 }
 0x29a   :  { %v1784_v2 = vpop.f32.mrb[2].mxu0  ;;  %v1855_v4 = vpop.f32.mrb[2].mxu1 }
 0x29b   :  { %v1870_v5 = vadd.f32 %v1868_v1, %v1784_v2  ;;  %v1872_v6 = vadd.f32 %v1868_v1, %v1855_v4  ;;  %v1786_v9 = vpop.f32.mrb[3].mxu0  ;;  %v1857_v12 = vpop.f32.mrb[3].mxu1 }
 0x29c   :  { %v1871_v17 = vadd.f32 %v1868_v1, %v1786_v9  ;;  %v1873_v18 = vadd.f32 %v1868_v1, %v1857_v12  ;;  %v1894_v9 = vld [vmem:[%s4447_s5] sm:$0xff] }
 0x29d   :  { %v4194_v13 = vmax.f32 %v1870_v5, 0.0  ;;  %v4196_v49 = vmax.f32 %v1872_v6, 0.0 }
 0x29e   :  { %v4202_v37 = vmax.f32 %v1871_v17, 0.0  ;;  %v4208_v20 = vmax.f32 %v1873_v18, 0.0 }
 0x29f   :  { %1899 = vrot.lane.b32.xlu0 %v4196_v49, %s3577_s1  ;;  %1895 = vrot.lane.b32.xlu1 %v4194_v13, %s3577_s1 }
 0x2a3   :  { %1878 = vrot.lane.b32.xlu0 %v4194_v13, %s3578_s0  ;;  %1897 = vrot.lane.b32.xlu1 %v4202_v37, %s3577_s1 }
 0x2a7   :  { %1882 = vrot.lane.b32.xlu0 %v4196_v49, %s3578_s0  ;;  %1901 = vrot.lane.b32.xlu1 %v4208_v20, %s3577_s1 }
 0x2ab   :  { %2202 = vrot.lane.b32.xlu0 %v4194_v13, %s3579_s24  ;;  %1880 = vrot.lane.b32.xlu1 %v4202_v37, %s3578_s0 }
 0x2af   :  { %2206 = vrot.lane.b32.xlu0 %v4196_v49, %s3579_s24  ;;  %1884 = vrot.lane.b32.xlu1 %v4208_v20, %s3578_s0 }
 0x2b3   :  { %2368 = vrot.lane.b32.xlu0 %v4194_v13, %s3580_s25  ;;  %2204 = vrot.lane.b32.xlu1 %v4202_v37, %s3579_s24 }
 0x2b7   :  { %2372 = vrot.lane.b32.xlu0 %v4196_v49, %s3580_s25  ;;  %2208 = vrot.lane.b32.xlu1 %v4208_v20, %s3579_s24 }
 0x2bb   :  { %2684 = vrot.lane.b32.xlu0 %v4194_v13, %s3581_s26  ;;  %2370 = vrot.lane.b32.xlu1 %v4202_v37, %s3580_s25 }
 0x2bf   :  { %2688 = vrot.lane.b32.xlu0 %v4196_v49, %s3581_s26  ;;  %2374 = vrot.lane.b32.xlu1 %v4208_v20, %s3580_s25 }
 0x2c3   :  { %2850 = vrot.lane.b32.xlu0 %v4194_v13, %s3582_s27  ;;  %2686 = vrot.lane.b32.xlu1 %v4202_v37, %s3581_s26 }
 0x2c7   :  { %2854 = vrot.lane.b32.xlu0 %v4196_v49, %s3582_s27  ;;  %2690 = vrot.lane.b32.xlu1 %v4208_v20, %s3581_s26 }
 0x2cb   :  { %3016 = vrot.lane.b32.xlu0 %v4194_v13, %s3583_s28  ;;  %2852 = vrot.lane.b32.xlu1 %v4202_v37, %s3582_s27 }
 0x2cf   :  { %3020 = vrot.lane.b32.xlu0 %v4196_v49, %s3583_s28  ;;  %2856 = vrot.lane.b32.xlu1 %v4208_v20, %s3582_s27 }
 0x2d3   :  { %3182 = vrot.lane.b32.xlu0 %v4194_v13, %s3584_s29  ;;  %3018 = vrot.lane.b32.xlu1 %v4202_v37, %s3583_s28 }
 0x2d7   :  { %3186 = vrot.lane.b32.xlu0 %v4196_v49, %s3584_s29  ;;  %3022 = vrot.lane.b32.xlu1 %v4208_v20, %s3583_s28 }
 0x2db   :  { %3351 = vperm.xlu0 %3548, %v3348_v35   ;;  %3184 = vrot.lane.b32.xlu1 %v4202_v37, %s3584_s29 }
 0x2df   :  { %3188 = vrot.lane.b32.xlu1 %v4208_v20, %s3584_s29 }
 0x311   :  { %v1900_v48 = vpop.permute.xlu0 %1899  ;;  %v1896_v36 = vpop.permute.xlu1 %1895 }
 0x315   :  { %v1879_v46 = vpop.permute.xlu0 %1878  ;;  %v1898_v38 = vpop.permute.xlu1 %1897 }
 0x316   :  { %v1905_v25 = vsel %vm299_vm0, %v1896_v36, %v1898_v38  ;;  %v1904_v30 = vsel %vm299_vm0, %v1898_v38, %v1900_v48 }
 0x317   :  { %v1908_v27 = vmul.f32 %v1905_v25, %v3927_v51  ;;  %v1911_v51 = vld [vmem:[%s4447_s5 + $0x8] sm:$0xff]  ;;  %v1909_v59 = vmul.f32 %v1904_v30, %v3930_v52  ;;  %v2218_v25 = vld [vmem:[%s4447_s5 + $0x10] sm:$0xff] }
 0x319   :  { %v1883_v31 = vpop.permute.xlu0 %1882  ;;  %1915 = vmatprep.subr.mxu0 %v1908_v27  ;;  %v1902_v32 = vpop.permute.xlu1 %1901 }
 0x31a   :  { %v1903_v40 = vsel %vm299_vm0, %v1900_v48, %v1902_v32  ;;  %v1906_v41 = vsel %vm299_vm0, %v1902_v32, %v1896_v36 }
 0x31b   :  { %v1907_v56 = vmul.f32 %v1906_v41, %v3933_v53  ;;  %v1910_v57 = vmul.f32 %v1903_v40, %v3936_v54 }
 0x31d   :  { %v2203_v62 = vpop.permute.xlu0 %2202  ;;  %1916 = vmatpush1.msra.mxu0 %v1907_v56  ;;  %1986 = vmatprep.subr.mxu1 %v1910_v57  ;;  %v1881_v63 = vpop.permute.xlu1 %1880 }
 0x31e   :  { %v1888_v1 = vsel %vm265_vm1, %v1879_v46, %v1881_v63  ;;  %3389 = vmatmul.mubr.msk.f32.vlgmr.msra.gmra.mrb[4].mxu0 %vm325_vm2, %v1911_v51  ;;  %1987 = vmatpush1.msra.mxu1 %v1909_v59  ;;  %v1887_v52 = vsel %vm265_vm1, %v1881_v63, %v1883_v31 }
 0x31f   :  { %v1891_v53 = vmul.f32 %v1888_v1, %v3953_v3  ;;  %3390 = vmatmul.mubr.msk.f32.vlgmr.msra.gmra.mrb[4].mxu1 %vm325_vm2, %v1911_v51  ;;  %2124 = vmatprep.mubr.f32.mxu0 %v3576_v0  ;;  %v1892_v12 = vmul.f32 %v1887_v52, %v3962_v8  ;;  %v2384_v51 = vld [vmem:[%s4447_s5 + $0x18] sm:$0xff] }
 0x320   :  { %2195 = vmatprep.mubr.f32.mxu1 %v3576_v0 }
 0x321   :  { %v2207_v54 = vpop.permute.xlu0 %2206  ;;  %2060 = vmatprep.subr.mxu0 %v1891_v53  ;;  %v1885_v2 = vpop.permute.xlu1 %1884 }
 0x322   :  { %v1886_v4 = vsel %vm265_vm1, %v1883_v31, %v1885_v2  ;;  %v1889_v5 = vsel %vm265_vm1, %v1885_v2, %v1879_v46 }
 0x323   :  { %v1890_v3 = vmul.f32 %v1889_v5, %v3967_v10  ;;  %v1893_v6 = vmul.f32 %v1886_v4, %v3970_v11 }
 0x325   :  { %v2369_v17 = vpop.permute.xlu0 %2368  ;;  %2061 = vmatpush1.msra.mxu0 %v1890_v3  ;;  %2131 = vmatprep.subr.mxu1 %v1893_v6  ;;  %v2205_v18 = vpop.permute.xlu1 %2204 }
 0x326   :  { %v2212_v35 = vsel %vm624_vm3, %v2203_v62, %v2205_v18  ;;  %3391 = vmatmul.mubr.msk.f32.vlgmr.msra.gmra.mrb[4].mxu0 %vm325_vm2, %v1894_v9  ;;  %2132 = vmatpush1.msra.mxu1 %v1892_v12  ;;  %v2211_v8 = vsel %vm624_vm3, %v2205_v18, %v2207_v54 }
 0x327   :  { %v2215_v10 = vmul.f32 %v2212_v35, %v3986_v21  ;;  %3392 = vmatmul.mubr.msk.f32.vlgmr.msra.gmra.mrb[4].mxu1 %vm325_vm2, %v1894_v9  ;;  %2286 = vmatprep.mubr.f32.mxu0 %v3576_v0  ;;  %v2216_v27 = vmul.f32 %v2211_v8, %v3995_v26  ;;  %v2700_v9 = vld [vmem:[%s4447_s5 + $0x28] sm:$0xff] }
 0x328   :  { %2357 = vmatprep.mubr.f32.mxu1 %v3576_v0 }
 0x329   :  { %v2373_v11 = vpop.permute.xlu0 %2372  ;;  %2222 = vmatprep.subr.mxu0 %v2215_v10  ;;  %v2209_v48 = vpop.permute.xlu1 %2208 }
 0x32a   :  { %v2210_v36 = vsel %vm624_vm3, %v2207_v54, %v2209_v48  ;;  %v2213_v46 = vsel %vm624_vm3, %v2209_v48, %v2203_v62  ;;  %v2866_v48 = vld [vmem:[%s4447_s5 + $0x30] sm:$0xff] }
 0x32b   :  { %v2214_v21 = vmul.f32 %v2213_v46, %v4000_v28  ;;  %v2217_v38 = vmul.f32 %v2210_v36, %v4003_v29 }
 0x32d   :  { %v2685_v30 = vpop.permute.xlu0 %2684  ;;  %2223 = vmatpush1.msra.mxu0 %v2214_v21  ;;  %2293 = vmatprep.subr.mxu1 %v2217_v38  ;;  %v2371_v31 = vpop.permute.xlu1 %2370 }
 0x32e   :  { %v2378_v32 = vsel %vm807_vm4, %v2369_v17, %v2371_v31  ;;  %3393 = vmatmul.mubr.msk.f32.vlgmr.msra.gmra.mrb[4].mxu0 %vm325_vm2, %v2218_v25  ;;  %2294 = vmatpush1.msra.mxu1 %v2216_v27  ;;  %v2377_v26 = vsel %vm807_vm4, %v2371_v31, %v2373_v11  ;;  %v3032_v31 = vld [vmem:[%s4447_s5 + $0x38] sm:$0xff] }
 0x32f   :  { %v2381_v28 = vmul.f32 %v2378_v32, %v4019_v47  ;;  %3394 = vmatmul.mubr.msk.f32.vlgmr.msra.gmra.mrb[4].mxu1 %vm325_vm2, %v2218_v25  ;;  %2452 = vmatprep.mubr.f32.mxu0 %v3576_v0  ;;  %v2382_v59 = vmul.f32 %v2377_v26, %v4028_v58 }
 0x330   :  { %2523 = vmatprep.mubr.f32.mxu1 %v3576_v0 }
 0x331   :  { %v2689_v29 = vpop.permute.xlu0 %2688  ;;  %2388 = vmatprep.subr.mxu0 %v2381_v28  ;;  %v2375_v40 = vpop.permute.xlu1 %2374 }
 0x332   :  { %v2376_v41 = vsel %vm807_vm4, %v2373_v11, %v2375_v40  ;;  %v2379_v56 = vsel %vm807_vm4, %v2375_v40, %v2369_v17 }
 0x333   :  { %v2380_v47 = vmul.f32 %v2379_v56, %v4033_v60  ;;  %v2383_v57 = vmul.f32 %v2376_v41, %v4036_v61 }
 0x335   :  { %v2851_v62 = vpop.permute.xlu0 %2850  ;;  %2389 = vmatpush1.msra.mxu0 %v2380_v47  ;;  %2459 = vmatprep.subr.mxu1 %v2383_v57  ;;  %v2687_v63 = vpop.permute.xlu1 %2686 }
 0x336   :  { %v2693_v1 = vsel %vm1140_vm5, %v2687_v63, %v2689_v29  ;;  %3395 = vmatmul.mubr.msk.f32.vlgmr.msra.gmra.mrb[4].mxu0 %vm325_vm2, %v2384_v51  ;;  %2460 = vmatpush1.msra.mxu1 %v2382_v59  ;;  %v2694_v53 = vsel %vm1140_vm5, %v2685_v30, %v2687_v63 }
 0x337   :  { %v2697_v60 = vmul.f32 %v2693_v1, %v4055_v15  ;;  %2538 = vmatprep.subr.mxu0 %v4202_v37  ;;  %3396 = vmatmul.mubr.msk.f32.vlgmr.msra.gmra.mrb[4].mxu1 %vm325_vm2, %v2384_v51  ;;  %v2696_v37 = vmul.f32 %v2694_v53, %v4070_v19 }
 0x338   :  { %2539 = vmatpush1.msra.mxu0 %v4194_v13  ;;  %2609 = vmatprep.subr.mxu1 %v4208_v20 }
 0x339   :  { %2610 = vmatpush1.msra.mxu1 %v4196_v49  ;;  %v2855_v58 = vpop.permute.xlu0 %2854  ;;  %2704 = vmatprep.subr.mxu0 %v2697_v60  ;;  %v2691_v61 = vpop.permute.xlu1 %2690  ;;  %v2534_v49 = vld [vmem:[%s4447_s5 + $0x20] sm:$0xff] }
 0x33a   :  { %v2695_v52 = vsel %vm1140_vm5, %v2691_v61, %v2685_v30  ;;  %2602 = vmatprep.mubr.f32.mxu0 %v3576_v0  ;;  %2673 = vmatprep.mubr.f32.mxu1 %v3576_v0  ;;  %v2692_v15 = vsel %vm1140_vm5, %v2689_v29, %v2691_v61 }
 0x33b   :  { %v2699_v13 = vmul.f32 %v2695_v52, %v4060_v16  ;;  %v2698_v2 = vmul.f32 %v2692_v15, %v4075_v22 }
 0x33d   :  { %v3017_v20 = vpop.permute.xlu0 %3016  ;;  %2775 = vmatprep.subr.mxu1 %v2699_v13  ;;  %v2853_v54 = vpop.permute.xlu1 %2852 }
 0x33e   :  { %v2859_v4 = vsel %vm1323_vm6, %v2853_v54, %v2855_v58  ;;  %3397 = vmatmul.mubr.msk.f32.vlgmr.msra.gmra.mrb[4].mxu0 %vm325_vm2, %v2534_v49  ;;  %v2860_v22 = vsel %vm1323_vm6, %v2851_v62, %v2853_v54 }
 0x33f   :  { %v2863_v5 = vmul.f32 %v2859_v4, %v4091_v33  ;;  %2705 = vmatpush1.msra.mxu0 %v2696_v37  ;;  %3398 = vmatmul.mubr.msk.f32.vlgmr.msra.gmra.mrb[4].mxu1 %vm325_vm2, %v2534_v49  ;;  %v2862_v12 = vmul.f32 %v2860_v22, %v4104_v44 }
 0x340   :  { %2776 = vmatpush1.msra.mxu1 %v2698_v2  ;;  %2768 = vmatprep.mubr.f32.mxu0 %v3576_v0 }
 0x341   :  { %v3021_v16 = vpop.permute.xlu0 %3020  ;;  %2870 = vmatprep.subr.mxu0 %v2863_v5  ;;  %v2857_v19 = vpop.permute.xlu1 %2856  ;;  %2839 = vmatprep.mubr.f32.mxu1 %v3576_v0 }
 0x342   :  { %v2861_v3 = vsel %vm1323_vm6, %v2857_v19, %v2851_v62  ;;  %v2858_v33 = vsel %vm1323_vm6, %v2855_v58, %v2857_v19 }
 0x343   :  { %v2865_v6 = vmul.f32 %v2861_v3, %v4096_v34  ;;  %v2864_v18 = vmul.f32 %v2858_v33, %v4109_v55 }
 0x345   :  { %2941 = vmatprep.subr.mxu1 %v2865_v6  ;;  %v3019_v17 = vpop.permute.xlu1 %3018  ;;  %v3183_v10 = vpop.permute.xlu0 %3182 }
 0x346   :  { %v3025_v35 = vsel %vm1506_vm7, %v3019_v17, %v3021_v16  ;;  %3399 = vmatmul.mubr.msk.f32.vlgmr.msra.gmra.mrb[4].mxu0 %vm325_vm2, %v2700_v9  ;;  %v3026_v44 = vsel %vm1506_vm7, %v3017_v20, %v3019_v17 }
 0x347   :  { %v3029_v8 = vmul.f32 %v3025_v35, %v4124_v7  ;;  %2871 = vmatpush1.msra.mxu0 %v2862_v12  ;;  %3400 = vmatmul.mubr.msk.f32.vlgmr.msra.gmra.mrb[4].mxu1 %vm325_vm2, %v2700_v9  ;;  %v3028_v36 = vmul.f32 %v3026_v44, %v4137_v45 }
 0x348   :  { %2942 = vmatpush1.msra.mxu1 %v2864_v18  ;;  %2934 = vmatprep.mubr.f32.mxu0 %v3576_v0 }
 0x349   :  { %3036 = vmatprep.subr.mxu0 %v3029_v8  ;;  %v3023_v34 = vpop.permute.xlu1 %3022  ;;  %3005 = vmatprep.mubr.f32.mxu1 %v3576_v0  ;;  %v3187_v46 = vpop.permute.xlu0 %3186 }
 0x34a   :  { %v3027_v55 = vsel %vm1506_vm7, %v3023_v34, %v3017_v20  ;;  %v3024_v11 = vsel %vm1506_vm7, %v3021_v16, %v3023_v34 }
 0x34b   :  { %v3031_v7 = vmul.f32 %v3027_v55, %v4129_v42  ;;  %v3030_v38 = vmul.f32 %v3024_v11, %v4142_v14 }
 0x34d   :  { %3107 = vmatprep.subr.mxu1 %v3031_v7  ;;  %v3185_v21 = vpop.permute.xlu1 %3184 }
 0x34e   :  { %v3191_v25 = vsel %vm1689_vm8, %v3185_v21, %v3187_v46  ;;  %3401 = vmatmul.mubr.msk.f32.vlgmr.msra.gmra.mrb[4].mxu0 %vm325_vm2, %v2866_v48  ;;  %v3192_v45 = vsel %vm1689_vm8, %v3183_v10, %v3185_v21 }
 0x34f   :  { %v3195_v27 = vmul.f32 %v4157_v23, %v3191_v25  ;;  %3037 = vmatpush1.msra.mxu0 %v3028_v36  ;;  %3402 = vmatmul.mubr.msk.f32.vlgmr.msra.gmra.mrb[4].mxu1 %vm325_vm2, %v2866_v48  ;;  %v3194_v32 = vmul.f32 %v4169_v39, %v3192_v45 }
 0x350   :  { %3108 = vmatpush1.msra.mxu1 %v3030_v38  ;;  %3100 = vmatprep.mubr.f32.mxu0 %v3576_v0 }
 0x351   :  { %3202 = vmatprep.subr.mxu0 %v3195_v27  ;;  %v3189_v42 = vpop.permute.xlu1 %3188  ;;  %3171 = vmatprep.mubr.f32.mxu1 %v3576_v0 }
 0x352   :  { %v3193_v14 = vsel %vm1689_vm8, %v3189_v42, %v3183_v10  ;;  %v3190_v30 = vsel %vm1689_vm8, %v3187_v46, %v3189_v42 }
 0x353   :  { %v3197_v23 = vmul.f32 %v4160_v24, %v3193_v14  ;;  %v3196_v28 = vmul.f32 %v4174_v50, %v3190_v30 }
 0x355   :  { %3273 = vmatprep.subr.mxu1 %v3197_v23 }
 0x356   :  { %3403 = vmatmul.mubr.msk.f32.vlgmr.msra.gmra.mrb[4].mxu0 %vm325_vm2, %v3032_v31 }
 0x357   :  { %3203 = vmatpush1.msra.mxu0 %v3194_v32  ;;  %3404 = vmatmul.mubr.msk.f32.vlgmr.msra.gmra.mrb[4].mxu1 %vm325_vm2, %v3032_v31 }
 0x358   :  { %3274 = vmatpush1.msra.mxu1 %v3196_v28  ;;  %3266 = vmatprep.mubr.f32.mxu0 %v3576_v0 }
 0x359   :  { %3337 = vmatprep.mubr.f32.mxu1 %v3576_v0 }
 0x35a   :  { %v3352_v24 = vpop.permute.xlu0 %3351 }
 0x35e   :  { %3405 = vmatmul.mubr.msk.f32.vlgmr.msra.gmra.mrb[4].mxu0 %vm325_vm2, %v3198_v43 }
 0x35f   :  { %3406 = vmatmul.mubr.msk.f32.vlgmr.msra.gmra.mrb[4].mxu1 %vm325_vm2, %v3198_v43 }
 0x431   :  { %v3268_v39 = vpop.f32.mrb[4].mxu0 }
 0x432   :  { %v3354_v50 = vadd.f32 %v3352_v24, %v3268_v39  ;;  %v3270_v26 = vpop.f32.mrb[5].mxu0  ;;  %v3339_v29 = vpop.f32.mrb[4].mxu1 }
 0x433   :  { %v3355_v40 = vadd.f32 %v3352_v24, %v3270_v26  ;;  %v3356_v41 = vadd.f32 %v3352_v24, %v3339_v29  ;;  %v3341_v56 = vpop.f32.mrb[5].mxu1 }
 0x434   :  { %3358 = vst [vmem:[%s4449_s7] sm:$0xff] %v3354_v50  ;;  %v3357_v0 = vadd.f32 %v3352_v24, %v3341_v56 }
 0x435   :  { %3359 = vst [vmem:[%s4449_s7 + $0x8] sm:$0xff] %v3355_v40  ;;  %3360 = vst [vmem:[%s4449_s7 + $0x10] sm:$0xff] %v3356_v41 }
 0x436   :  { %3361 = vst [vmem:[%s4449_s7 + $0x18] sm:$0xff] %v3357_v0 }
 0x437   :  { %3366 = vsyncpa [#allocation3], 1 }

</bundles_post_ra>
